<compile_context>
chip_gen: v7x
topology: tpu7x:2x2x1
jax: 0.10.0
libtpu: 0.0.40
codegen_flags: <defaults>
</compile_context>

<pallas_src>
import jax
import jax.numpy as jnp
from jax.experimental import pallas as pl
from jax.experimental.pallas import tpu as pltpu


def _shift2d(a, dy, dx):
    """b[y, x, :] = a[y+dy, x+dx, :]; zero outside the image (conv padding=1)."""
    H, W, C = a.shape
    if dy > 0:
        a = jnp.concatenate([a[dy:], jnp.zeros((dy, W, C), a.dtype)], axis=0)
    elif dy < 0:
        a = jnp.concatenate([jnp.zeros((-dy, W, C), a.dtype), a[:H + dy]], axis=0)
    if dx > 0:
        a = jnp.concatenate([a[:, dx:], jnp.zeros((H, dx, C), a.dtype)], axis=1)
    elif dx < 0:
        a = jnp.concatenate([jnp.zeros((H, -dx, C), a.dtype), a[:, :W + dx]], axis=1)
    return a


def bottleneck_kernel(x_ref, w1_ref, w2_ref, w3_ref, b1_ref, b2_ref, b3_ref,
                      out_ref):
    """Fused conv1x1 -> conv3x3 -> conv1x1 (+bias/ReLU epilogues) + identity.

    x_ref:   (1, H, W, Cin)          f32 NHWC block (one image per grid step)
    w1_ref:  (Cin, width)            bf16, BN1 scale pre-folded
    w2_ref:  (3, 3, width, width)    bf16 HWIO, BN2 scale pre-folded
    w3_ref:  (width, Cout)           bf16, BN3 scale pre-folded
    b*_ref:  (1, C)                  f32 folded BatchNorm biases
    out_ref: (1, H, W, Cout)         f32
    """
    _, H, W, Cin = x_ref.shape
    width = w1_ref.shape[1]
    Cout = w3_ref.shape[1]
    M = H * W

    # ---- conv1 (1x1) + bias + ReLU ---------------------------------------
    xf = x_ref[0].reshape(M, Cin)
    h1 = jnp.dot(xf.astype(jnp.bfloat16), w1_ref[...],
                 preferred_element_type=jnp.float32)
    h1 = jnp.maximum(h1 + b1_ref[...], 0.0)                     # (M, width) f32

    # ---- conv2 (3x3, stride=1, pad=1) + bias + ReLU -----------------------
    # Nine shifted matmuls on values; the pad=1 border is handled by the
    # zero-filled shifts (no padded VMEM scratch, no masked partial stores).
    h1_3d = h1.reshape(H, W, width)
    acc = jnp.zeros((M, width), jnp.float32)
    for dy in (-1, 0, 1):
        for dx in (-1, 0, 1):
            tap = _shift2d(h1_3d, dy, dx).reshape(M, width)
            acc = acc + jnp.dot(tap.astype(jnp.bfloat16),
                                w2_ref[dy + 1, dx + 1],
                                preferred_element_type=jnp.float32)
    h2 = jnp.maximum(acc + b2_ref[...], 0.0)                    # (M, width) f32

    # ---- conv3 (1x1) + bias + identity add + ReLU --------------------------
    h3 = jnp.dot(h2.astype(jnp.bfloat16), w3_ref[...],
                 preferred_element_type=jnp.float32)
    h3 = h3 + b3_ref[...]
    identity = x_ref[0].reshape(M, Cin)        # reload at epilogue; downsample=None
    out = jnp.maximum(h3 + identity, 0.0)
    out_ref[0] = out.reshape(H, W, Cout).astype(out_ref.dtype)


def bottleneck_forward(x_nhwc, w1, w2, w3, b1, b2, b3):
    """x_nhwc f32; w1/w2/w3 bf16 with BN scales folded in; b1/b2/b3 f32."""
    N, H, W, Cin = x_nhwc.shape
    width = w1.shape[1]
    Cout = w3.shape[1]
    assert Cin == Cout, "downsample=None requires inplanes == planes * expansion"

    b1 = b1.reshape(1, -1).astype(jnp.float32)
    b2 = b2.reshape(1, -1).astype(jnp.float32)
    b3 = b3.reshape(1, -1).astype(jnp.float32)

    weight_bytes = (w1.size + w2.size + w3.size) * 2 + (b1.size + b2.size + b3.size) * 4
    flops = 2 * N * H * W * (Cin * width + 9 * width * width + width * Cout)
    bytes_accessed = N * H * W * (Cin + Cout) * 4 + weight_bytes

    # VMEM budget: double-buffered x/out blocks + resident weights + in-kernel
    # intermediates, with headroom; capped conservatively for v7x's 64 MiB VMEM.
    block_bytes = H * W * (Cin + Cout) * 4
    interm_bytes = 12 * H * W * max(width, Cout) * 4
    vmem_limit = int(min(2 * block_bytes + 2 * weight_bytes + interm_bytes + (4 << 20),
                         32 << 20))

    return pl.pallas_call(
        bottleneck_kernel,
        out_shape=jax.ShapeDtypeStruct((N, H, W, Cout), jnp.float32),
        grid=(N,),
        in_specs=[
            pl.BlockSpec((1, H, W, Cin), lambda n: (n, 0, 0, 0)),       # x (pipelined)
            pl.BlockSpec((Cin, width), lambda n: (0, 0)),               # w1 (resident)
            pl.BlockSpec((3, 3, width, width), lambda n: (0, 0, 0, 0)), # w2 (resident)
            pl.BlockSpec((width, Cout), lambda n: (0, 0)),              # w3 (resident)
            pl.BlockSpec((1, width), lambda n: (0, 0)),                 # b1
            pl.BlockSpec((1, width), lambda n: (0, 0)),                 # b2
            pl.BlockSpec((1, Cout), lambda n: (0, 0)),                  # b3
        ],
        out_specs=pl.BlockSpec((1, H, W, Cout), lambda n: (n, 0, 0, 0)),
        compiler_params=pltpu.CompilerParams(
            dimension_semantics=("parallel",),
            vmem_limit_bytes=vmem_limit),
        cost_estimate=pl.CostEstimate(flops=flops, transcendentals=0,
                                      bytes_accessed=bytes_accessed),
    )(x_nhwc, w1, w2, w3, b1, b2, b3)


def reference_forward(x, w1, w2, w3, b1, b2, b3):
    """Pure-JAX NHWC reference with the same bf16-in / f32-accumulate math."""
    Cin = x.shape[-1]
    width = w1.shape[1]
    Cout = w3.shape[1]
    dn = ('NHWC', 'HWIO', 'NHWC')
    h = jax.lax.conv_general_dilated(
        x.astype(jnp.bfloat16), w1.reshape(1, 1, Cin, width), (1, 1), 'VALID',
        dimension_numbers=dn, preferred_element_type=jnp.float32)
    h = jnp.maximum(h + b1, 0.0)
    h = jax.lax.conv_general_dilated(
        h.astype(jnp.bfloat16), w2, (1, 1), [(1, 1), (1, 1)],
        dimension_numbers=dn, preferred_element_type=jnp.float32)
    h = jnp.maximum(h + b2, 0.0)
    h = jax.lax.conv_general_dilated(
        h.astype(jnp.bfloat16), w3.reshape(1, 1, width, Cout), (1, 1), 'VALID',
        dimension_numbers=dn, preferred_element_type=jnp.float32)
    h = h + b3
    return jnp.maximum(h + x, 0.0)


def fold_bn(C, seed):
    """Deterministic eval-mode BatchNorm params folded into scale/bias."""
    idx = jnp.arange(C, dtype=jnp.float32)
    gamma = 1.0 + 0.1 * jnp.cos(idx + seed)
    beta = 0.1 * jnp.sin(idx + seed)
    mean = 0.05 * jnp.sin(0.5 * idx + seed)
    var = 1.0 + 0.1 * jnp.cos(0.3 * idx + seed)
    eps = 1e-5
    scale = gamma / jnp.sqrt(var + eps)
    bias = beta - mean * scale
    return scale, bias


if __name__ == "__main__":
    # Bottleneck(inplanes=128, planes=32): width=32, out channels=128 (== inplanes
    # so the identity add is valid; Cout=128 keeps the output store lane-dense).
    N, Cin, H, W = 2, 128, 16, 16
    planes = 32
    width = planes            # int(planes * (64/64)) * 1
    Cout = planes * 4         # expansion = 4

    key = jax.random.PRNGKey(0)
    kx, k1, k2, k3 = jax.random.split(key, 4)
    x_nchw = jax.random.normal(kx, (N, Cin, H, W), jnp.float32)

    # PyTorch-style OIHW conv weights (bias=False), deterministic.
    w1_oihw = 0.1 * jax.random.normal(k1, (width, Cin, 1, 1), jnp.float32)
    w2_oihw = 0.1 * jax.random.normal(k2, (width, width, 3, 3), jnp.float32)
    w3_oihw = 0.1 * jax.random.normal(k3, (Cout, width, 1, 1), jnp.float32)

    s1, b1 = fold_bn(width, 0.0)
    s2, b2 = fold_bn(width, 1.0)
    s3, b3 = fold_bn(Cout, 2.0)

    # NHWC relayout + fold the BN scales into the conv weights (inference mode),
    # then cast weights to bf16 for the MXU (f32 accumulation in the kernel).
    x_nhwc = jnp.transpose(x_nchw, (0, 2, 3, 1))
    w1 = (jnp.transpose(w1_oihw[:, :, 0, 0], (1, 0)) * s1[None, :]).astype(jnp.bfloat16)
    w2 = (jnp.transpose(w2_oihw, (2, 3, 1, 0)) * s2[None, None, None, :]).astype(jnp.bfloat16)
    w3 = (jnp.transpose(w3_oihw[:, :, 0, 0], (1, 0)) * s3[None, :]).astype(jnp.bfloat16)

    out_nhwc = bottleneck_forward(x_nhwc, w1, w2, w3, b1, b2, b3)
    out_nchw = jnp.transpose(out_nhwc, (0, 3, 1, 2))
    jax.block_until_ready(out_nchw)

    ref_nhwc = reference_forward(x_nhwc, w1, w2, w3, b1, b2, b3)
    assert out_nchw.shape == (N, Cin, H, W)
    assert jnp.allclose(out_nhwc, ref_nhwc, atol=3e-2, rtol=3e-2), "mismatch vs reference"
    print("KERNEL_OK")
</pallas_src>

<mosaic_0001>
module attributes {stable_mosaic.version = 11 : i64} {
  func.func @bottleneck_kernel(%arg0: i32, %arg1: memref<1x16x16x128xf32, #tpu.memory_space<vmem>>, %arg2: memref<128x32xbf16, #tpu.memory_space<vmem>>, %arg3: memref<3x3x32x32xbf16, #tpu.memory_space<vmem>>, %arg4: memref<32x128xbf16, #tpu.memory_space<vmem>>, %arg5: memref<1x32xf32, #tpu.memory_space<vmem>>, %arg6: memref<1x32xf32, #tpu.memory_space<vmem>>, %arg7: memref<1x128xf32, #tpu.memory_space<vmem>>, %arg8: memref<1x16x16x128xf32, #tpu.memory_space<vmem>>) attributes {dimension_semantics = [#tpu.dimension_semantics<parallel>], iteration_bounds = array<i64: 2>, scalar_prefetch = 0 : i64, scratch_operands = 0 : i64, tpu.core_type = #tpu.core_type<tc>, window_params = [{transform_indices = @transform_0, window_bounds = array<i64: 1, 16, 16, 128>}, {pipeline_mode = #tpu.pipeline_mode<synchronous>, transform_indices = @transform_1, window_bounds = array<i64: 128, 32>}, {pipeline_mode = #tpu.pipeline_mode<synchronous>, transform_indices = @transform_2, window_bounds = array<i64: 3, 3, 32, 32>}, {pipeline_mode = #tpu.pipeline_mode<synchronous>, transform_indices = @transform_3, window_bounds = array<i64: 32, 128>}, {pipeline_mode = #tpu.pipeline_mode<synchronous>, transform_indices = @transform_4, window_bounds = array<i64: 1, 32>}, {pipeline_mode = #tpu.pipeline_mode<synchronous>, transform_indices = @transform_5, window_bounds = array<i64: 1, 32>}, {pipeline_mode = #tpu.pipeline_mode<synchronous>, transform_indices = @transform_6, window_bounds = array<i64: 1, 128>}, {transform_indices = @transform_7, window_bounds = array<i64: 1, 16, 16, 128>}]} {
    %c0 = arith.constant 0 : index
    %c0_0 = arith.constant 0 : index
    %c0_1 = arith.constant 0 : index
    %c0_2 = arith.constant 0 : index
    %0 = vector.load %arg1[%c0, %c0_0, %c0_1, %c0_2] : memref<1x16x16x128xf32, #tpu.memory_space<vmem>>, vector<1x16x16x128xf32>
    %1 = vector.shape_cast %0 : vector<1x16x16x128xf32> to vector<16x16x128xf32>
    %2 = vector.shape_cast %1 : vector<16x16x128xf32> to vector<256x128xf32>
    %3 = arith.truncf %2 : vector<256x128xf32> to vector<256x128xbf16>
    %c0_3 = arith.constant 0 : index
    %c0_4 = arith.constant 0 : index
    %4 = vector.load %arg2[%c0_3, %c0_4] : memref<128x32xbf16, #tpu.memory_space<vmem>>, vector<128x32xbf16>
    %cst = arith.constant dense<0.000000e+00> : vector<256x32xf32>
    %5 = tpu.matmul %3, %4, %cst {dimension_numbers = #tpu.dot_dimension_numbers<[1], [0], [0], [1], [0, 0, 1, 1], [], []>} : vector<256x128xbf16>, vector<128x32xbf16>, vector<256x32xf32> -> vector<256x32xf32>
    %c0_5 = arith.constant 0 : index
    %c0_6 = arith.constant 0 : index
    %6 = vector.load %arg5[%c0_5, %c0_6] : memref<1x32xf32, #tpu.memory_space<vmem>>, vector<1x32xf32>
    %7 = vector.broadcast %6 : vector<1x32xf32> to vector<256x32xf32>
    %8 = arith.addf %5, %7 : vector<256x32xf32>
    %cst_7 = arith.constant 0.000000e+00 : f32
    %9 = vector.broadcast %cst_7 : f32 to vector<256x32xf32>
    %10 = arith.maximumf %8, %9 : vector<256x32xf32>
    %11 = vector.shape_cast %10 : vector<256x32xf32> to vector<16x16x32xf32>
    %cst_8 = arith.constant 0.000000e+00 : f32
    %12 = vector.broadcast %cst_8 : f32 to vector<256x32xf32>
    %cst_9 = arith.constant 0.000000e+00 : f32
    %13 = vector.broadcast %cst_9 : f32 to vector<1x16x32xf32>
    %14 = vector.extract_strided_slice %11 {offsets = [0, 0, 0], sizes = [15, 16, 32], strides = [1, 1, 1]} : vector<16x16x32xf32> to vector<15x16x32xf32>
    %15 = tpu.concatenate %13, %14 in 0 : vector<1x16x32xf32>, vector<15x16x32xf32> -> vector<16x16x32xf32>
    %cst_10 = arith.constant 0.000000e+00 : f32
    %16 = vector.broadcast %cst_10 : f32 to vector<16x1x32xf32>
    %17 = vector.extract_strided_slice %15 {offsets = [0, 0, 0], sizes = [16, 15, 32], strides = [1, 1, 1]} : vector<16x16x32xf32> to vector<16x15x32xf32>
    %18 = tpu.concatenate %16, %17 in 1 : vector<16x1x32xf32>, vector<16x15x32xf32> -> vector<16x16x32xf32>
    %19 = vector.shape_cast %18 : vector<16x16x32xf32> to vector<256x32xf32>
    %20 = arith.truncf %19 : vector<256x32xf32> to vector<256x32xbf16>
    %c0_11 = arith.constant 0 : index
    %c0_12 = arith.constant 0 : index
    %c0_13 = arith.constant 0 : index
    %c0_14 = arith.constant 0 : index
    %21 = vector.load %arg3[%c0_11, %c0_12, %c0_13, %c0_14] : memref<3x3x32x32xbf16, #tpu.memory_space<vmem>>, vector<1x1x32x32xbf16>
    %22 = vector.shape_cast %21 : vector<1x1x32x32xbf16> to vector<32x32xbf16>
    %cst_15 = arith.constant dense<0.000000e+00> : vector<256x32xf32>
    %23 = tpu.matmul %20, %22, %cst_15 {dimension_numbers = #tpu.dot_dimension_numbers<[1], [0], [0], [1], [0, 0, 1, 1], [], []>} : vector<256x32xbf16>, vector<32x32xbf16>, vector<256x32xf32> -> vector<256x32xf32>
    %24 = arith.addf %12, %23 : vector<256x32xf32>
    %cst_16 = arith.constant 0.000000e+00 : f32
    %25 = vector.broadcast %cst_16 : f32 to vector<1x16x32xf32>
    %26 = vector.extract_strided_slice %11 {offsets = [0, 0, 0], sizes = [15, 16, 32], strides = [1, 1, 1]} : vector<16x16x32xf32> to vector<15x16x32xf32>
    %27 = tpu.concatenate %25, %26 in 0 : vector<1x16x32xf32>, vector<15x16x32xf32> -> vector<16x16x32xf32>
    %28 = vector.shape_cast %27 : vector<16x16x32xf32> to vector<256x32xf32>
    %29 = arith.truncf %28 : vector<256x32xf32> to vector<256x32xbf16>
    %c0_17 = arith.constant 0 : index
    %c1 = arith.constant 1 : index
    %c0_18 = arith.constant 0 : index
    %c0_19 = arith.constant 0 : index
    %30 = vector.load %arg3[%c0_17, %c1, %c0_18, %c0_19] : memref<3x3x32x32xbf16, #tpu.memory_space<vmem>>, vector<1x1x32x32xbf16>
    %31 = vector.shape_cast %30 : vector<1x1x32x32xbf16> to vector<32x32xbf16>
    %cst_20 = arith.constant dense<0.000000e+00> : vector<256x32xf32>
    %32 = tpu.matmul %29, %31, %cst_20 {dimension_numbers = #tpu.dot_dimension_numbers<[1], [0], [0], [1], [0, 0, 1, 1], [], []>} : vector<256x32xbf16>, vector<32x32xbf16>, vector<256x32xf32> -> vector<256x32xf32>
    %33 = arith.addf %24, %32 : vector<256x32xf32>
    %cst_21 = arith.constant 0.000000e+00 : f32
    %34 = vector.broadcast %cst_21 : f32 to vector<1x16x32xf32>
    %35 = vector.extract_strided_slice %11 {offsets = [0, 0, 0], sizes = [15, 16, 32], strides = [1, 1, 1]} : vector<16x16x32xf32> to vector<15x16x32xf32>
    %36 = tpu.concatenate %34, %35 in 0 : vector<1x16x32xf32>, vector<15x16x32xf32> -> vector<16x16x32xf32>
    %37 = vector.extract_strided_slice %36 {offsets = [0, 1, 0], sizes = [16, 15, 32], strides = [1, 1, 1]} : vector<16x16x32xf32> to vector<16x15x32xf32>
    %cst_22 = arith.constant 0.000000e+00 : f32
    %38 = vector.broadcast %cst_22 : f32 to vector<16x1x32xf32>
    %39 = tpu.concatenate %37, %38 in 1 : vector<16x15x32xf32>, vector<16x1x32xf32> -> vector<16x16x32xf32>
    %40 = vector.shape_cast %39 : vector<16x16x32xf32> to vector<256x32xf32>
    %41 = arith.truncf %40 : vector<256x32xf32> to vector<256x32xbf16>
    %c0_23 = arith.constant 0 : index
    %c2 = arith.constant 2 : index
    %c0_24 = arith.constant 0 : index
    %c0_25 = arith.constant 0 : index
    %42 = vector.load %arg3[%c0_23, %c2, %c0_24, %c0_25] : memref<3x3x32x32xbf16, #tpu.memory_space<vmem>>, vector<1x1x32x32xbf16>
    %43 = vector.shape_cast %42 : vector<1x1x32x32xbf16> to vector<32x32xbf16>
    %cst_26 = arith.constant dense<0.000000e+00> : vector<256x32xf32>
    %44 = tpu.matmul %41, %43, %cst_26 {dimension_numbers = #tpu.dot_dimension_numbers<[1], [0], [0], [1], [0, 0, 1, 1], [], []>} : vector<256x32xbf16>, vector<32x32xbf16>, vector<256x32xf32> -> vector<256x32xf32>
    %45 = arith.addf %33, %44 : vector<256x32xf32>
    %cst_27 = arith.constant 0.000000e+00 : f32
    %46 = vector.broadcast %cst_27 : f32 to vector<16x1x32xf32>
    %47 = vector.extract_strided_slice %11 {offsets = [0, 0, 0], sizes = [16, 15, 32], strides = [1, 1, 1]} : vector<16x16x32xf32> to vector<16x15x32xf32>
    %48 = tpu.concatenate %46, %47 in 1 : vector<16x1x32xf32>, vector<16x15x32xf32> -> vector<16x16x32xf32>
    %49 = vector.shape_cast %48 : vector<16x16x32xf32> to vector<256x32xf32>
    %50 = arith.truncf %49 : vector<256x32xf32> to vector<256x32xbf16>
    %c1_28 = arith.constant 1 : index
    %c0_29 = arith.constant 0 : index
    %c0_30 = arith.constant 0 : index
    %c0_31 = arith.constant 0 : index
    %51 = vector.load %arg3[%c1_28, %c0_29, %c0_30, %c0_31] : memref<3x3x32x32xbf16, #tpu.memory_space<vmem>>, vector<1x1x32x32xbf16>
    %52 = vector.shape_cast %51 : vector<1x1x32x32xbf16> to vector<32x32xbf16>
    %cst_32 = arith.constant dense<0.000000e+00> : vector<256x32xf32>
    %53 = tpu.matmul %50, %52, %cst_32 {dimension_numbers = #tpu.dot_dimension_numbers<[1], [0], [0], [1], [0, 0, 1, 1], [], []>} : vector<256x32xbf16>, vector<32x32xbf16>, vector<256x32xf32> -> vector<256x32xf32>
    %54 = arith.addf %45, %53 : vector<256x32xf32>
    %55 = vector.shape_cast %11 : vector<16x16x32xf32> to vector<256x32xf32>
    %56 = arith.truncf %55 : vector<256x32xf32> to vector<256x32xbf16>
    %c1_33 = arith.constant 1 : index
    %c1_34 = arith.constant 1 : index
    %c0_35 = arith.constant 0 : index
    %c0_36 = arith.constant 0 : index
    %57 = vector.load %arg3[%c1_33, %c1_34, %c0_35, %c0_36] : memref<3x3x32x32xbf16, #tpu.memory_space<vmem>>, vector<1x1x32x32xbf16>
    %58 = vector.shape_cast %57 : vector<1x1x32x32xbf16> to vector<32x32xbf16>
    %cst_37 = arith.constant dense<0.000000e+00> : vector<256x32xf32>
    %59 = tpu.matmul %56, %58, %cst_37 {dimension_numbers = #tpu.dot_dimension_numbers<[1], [0], [0], [1], [0, 0, 1, 1], [], []>} : vector<256x32xbf16>, vector<32x32xbf16>, vector<256x32xf32> -> vector<256x32xf32>
    %60 = arith.addf %54, %59 : vector<256x32xf32>
    %61 = vector.extract_strided_slice %11 {offsets = [0, 1, 0], sizes = [16, 15, 32], strides = [1, 1, 1]} : vector<16x16x32xf32> to vector<16x15x32xf32>
    %cst_38 = arith.constant 0.000000e+00 : f32
    %62 = vector.broadcast %cst_38 : f32 to vector<16x1x32xf32>
    %63 = tpu.concatenate %61, %62 in 1 : vector<16x15x32xf32>, vector<16x1x32xf32> -> vector<16x16x32xf32>
    %64 = vector.shape_cast %63 : vector<16x16x32xf32> to vector<256x32xf32>
    %65 = arith.truncf %64 : vector<256x32xf32> to vector<256x32xbf16>
    %c1_39 = arith.constant 1 : index
    %c2_40 = arith.constant 2 : index
    %c0_41 = arith.constant 0 : index
    %c0_42 = arith.constant 0 : index
    %66 = vector.load %arg3[%c1_39, %c2_40, %c0_41, %c0_42] : memref<3x3x32x32xbf16, #tpu.memory_space<vmem>>, vector<1x1x32x32xbf16>
    %67 = vector.shape_cast %66 : vector<1x1x32x32xbf16> to vector<32x32xbf16>
    %cst_43 = arith.constant dense<0.000000e+00> : vector<256x32xf32>
    %68 = tpu.matmul %65, %67, %cst_43 {dimension_numbers = #tpu.dot_dimension_numbers<[1], [0], [0], [1], [0, 0, 1, 1], [], []>} : vector<256x32xbf16>, vector<32x32xbf16>, vector<256x32xf32> -> vector<256x32xf32>
    %69 = arith.addf %60, %68 : vector<256x32xf32>
    %70 = vector.extract_strided_slice %11 {offsets = [1, 0, 0], sizes = [15, 16, 32], strides = [1, 1, 1]} : vector<16x16x32xf32> to vector<15x16x32xf32>
    %cst_44 = arith.constant 0.000000e+00 : f32
    %71 = vector.broadcast %cst_44 : f32 to vector<1x16x32xf32>
    %72 = tpu.concatenate %70, %71 in 0 : vector<15x16x32xf32>, vector<1x16x32xf32> -> vector<16x16x32xf32>
    %cst_45 = arith.constant 0.000000e+00 : f32
    %73 = vector.broadcast %cst_45 : f32 to vector<16x1x32xf32>
    %74 = vector.extract_strided_slice %72 {offsets = [0, 0, 0], sizes = [16, 15, 32], strides = [1, 1, 1]} : vector<16x16x32xf32> to vector<16x15x32xf32>
    %75 = tpu.concatenate %73, %74 in 1 : vector<16x1x32xf32>, vector<16x15x32xf32> -> vector<16x16x32xf32>
    %76 = vector.shape_cast %75 : vector<16x16x32xf32> to vector<256x32xf32>
    %77 = arith.truncf %76 : vector<256x32xf32> to vector<256x32xbf16>
    %c2_46 = arith.constant 2 : index
    %c0_47 = arith.constant 0 : index
    %c0_48 = arith.constant 0 : index
    %c0_49 = arith.constant 0 : index
    %78 = vector.load %arg3[%c2_46, %c0_47, %c0_48, %c0_49] : memref<3x3x32x32xbf16, #tpu.memory_space<vmem>>, vector<1x1x32x32xbf16>
    %79 = vector.shape_cast %78 : vector<1x1x32x32xbf16> to vector<32x32xbf16>
    %cst_50 = arith.constant dense<0.000000e+00> : vector<256x32xf32>
    %80 = tpu.matmul %77, %79, %cst_50 {dimension_numbers = #tpu.dot_dimension_numbers<[1], [0], [0], [1], [0, 0, 1, 1], [], []>} : vector<256x32xbf16>, vector<32x32xbf16>, vector<256x32xf32> -> vector<256x32xf32>
    %81 = arith.addf %69, %80 : vector<256x32xf32>
    %82 = vector.extract_strided_slice %11 {offsets = [1, 0, 0], sizes = [15, 16, 32], strides = [1, 1, 1]} : vector<16x16x32xf32> to vector<15x16x32xf32>
    %cst_51 = arith.constant 0.000000e+00 : f32
    %83 = vector.broadcast %cst_51 : f32 to vector<1x16x32xf32>
    %84 = tpu.concatenate %82, %83 in 0 : vector<15x16x32xf32>, vector<1x16x32xf32> -> vector<16x16x32xf32>
    %85 = vector.shape_cast %84 : vector<16x16x32xf32> to vector<256x32xf32>
    %86 = arith.truncf %85 : vector<256x32xf32> to vector<256x32xbf16>
    %c2_52 = arith.constant 2 : index
    %c1_53 = arith.constant 1 : index
    %c0_54 = arith.constant 0 : index
    %c0_55 = arith.constant 0 : index
    %87 = vector.load %arg3[%c2_52, %c1_53, %c0_54, %c0_55] : memref<3x3x32x32xbf16, #tpu.memory_space<vmem>>, vector<1x1x32x32xbf16>
    %88 = vector.shape_cast %87 : vector<1x1x32x32xbf16> to vector<32x32xbf16>
    %cst_56 = arith.constant dense<0.000000e+00> : vector<256x32xf32>
    %89 = tpu.matmul %86, %88, %cst_56 {dimension_numbers = #tpu.dot_dimension_numbers<[1], [0], [0], [1], [0, 0, 1, 1], [], []>} : vector<256x32xbf16>, vector<32x32xbf16>, vector<256x32xf32> -> vector<256x32xf32>
    %90 = arith.addf %81, %89 : vector<256x32xf32>
    %91 = vector.extract_strided_slice %11 {offsets = [1, 0, 0], sizes = [15, 16, 32], strides = [1, 1, 1]} : vector<16x16x32xf32> to vector<15x16x32xf32>
    %cst_57 = arith.constant 0.000000e+00 : f32
    %92 = vector.broadcast %cst_57 : f32 to vector<1x16x32xf32>
    %93 = tpu.concatenate %91, %92 in 0 : vector<15x16x32xf32>, vector<1x16x32xf32> -> vector<16x16x32xf32>
    %94 = vector.extract_strided_slice %93 {offsets = [0, 1, 0], sizes = [16, 15, 32], strides = [1, 1, 1]} : vector<16x16x32xf32> to vector<16x15x32xf32>
    %cst_58 = arith.constant 0.000000e+00 : f32
    %95 = vector.broadcast %cst_58 : f32 to vector<16x1x32xf32>
    %96 = tpu.concatenate %94, %95 in 1 : vector<16x15x32xf32>, vector<16x1x32xf32> -> vector<16x16x32xf32>
    %97 = vector.shape_cast %96 : vector<16x16x32xf32> to vector<256x32xf32>
    %98 = arith.truncf %97 : vector<256x32xf32> to vector<256x32xbf16>
    %c2_59 = arith.constant 2 : index
    %c2_60 = arith.constant 2 : index
    %c0_61 = arith.constant 0 : index
    %c0_62 = arith.constant 0 : index
    %99 = vector.load %arg3[%c2_59, %c2_60, %c0_61, %c0_62] : memref<3x3x32x32xbf16, #tpu.memory_space<vmem>>, vector<1x1x32x32xbf16>
    %100 = vector.shape_cast %99 : vector<1x1x32x32xbf16> to vector<32x32xbf16>
    %cst_63 = arith.constant dense<0.000000e+00> : vector<256x32xf32>
    %101 = tpu.matmul %98, %100, %cst_63 {dimension_numbers = #tpu.dot_dimension_numbers<[1], [0], [0], [1], [0, 0, 1, 1], [], []>} : vector<256x32xbf16>, vector<32x32xbf16>, vector<256x32xf32> -> vector<256x32xf32>
    %102 = arith.addf %90, %101 : vector<256x32xf32>
    %c0_64 = arith.constant 0 : index
    %c0_65 = arith.constant 0 : index
    %103 = vector.load %arg6[%c0_64, %c0_65] : memref<1x32xf32, #tpu.memory_space<vmem>>, vector<1x32xf32>
    %104 = vector.broadcast %103 : vector<1x32xf32> to vector<256x32xf32>
    %105 = arith.addf %102, %104 : vector<256x32xf32>
    %cst_66 = arith.constant 0.000000e+00 : f32
    %106 = vector.broadcast %cst_66 : f32 to vector<256x32xf32>
    %107 = arith.maximumf %105, %106 : vector<256x32xf32>
    %108 = arith.truncf %107 : vector<256x32xf32> to vector<256x32xbf16>
    %c0_67 = arith.constant 0 : index
    %c0_68 = arith.constant 0 : index
    %109 = vector.load %arg4[%c0_67, %c0_68] : memref<32x128xbf16, #tpu.memory_space<vmem>>, vector<32x128xbf16>
    %cst_69 = arith.constant dense<0.000000e+00> : vector<256x128xf32>
    %110 = tpu.matmul %108, %109, %cst_69 {dimension_numbers = #tpu.dot_dimension_numbers<[1], [0], [0], [1], [0, 0, 1, 1], [], []>} : vector<256x32xbf16>, vector<32x128xbf16>, vector<256x128xf32> -> vector<256x128xf32>
    %c0_70 = arith.constant 0 : index
    %c0_71 = arith.constant 0 : index
    %111 = vector.load %arg7[%c0_70, %c0_71] : memref<1x128xf32, #tpu.memory_space<vmem>>, vector<1x128xf32>
    %112 = vector.broadcast %111 : vector<1x128xf32> to vector<256x128xf32>
    %113 = arith.addf %110, %112 : vector<256x128xf32>
    %c0_72 = arith.constant 0 : index
    %c0_73 = arith.constant 0 : index
    %c0_74 = arith.constant 0 : index
    %c0_75 = arith.constant 0 : index
    %114 = vector.load %arg1[%c0_72, %c0_73, %c0_74, %c0_75] : memref<1x16x16x128xf32, #tpu.memory_space<vmem>>, vector<1x16x16x128xf32>
    %115 = vector.shape_cast %114 : vector<1x16x16x128xf32> to vector<16x16x128xf32>
    %116 = vector.shape_cast %115 : vector<16x16x128xf32> to vector<256x128xf32>
    %117 = arith.addf %113, %116 : vector<256x128xf32>
    %cst_76 = arith.constant 0.000000e+00 : f32
    %118 = vector.broadcast %cst_76 : f32 to vector<256x128xf32>
    %119 = arith.maximumf %117, %118 : vector<256x128xf32>
    %120 = vector.shape_cast %119 : vector<256x128xf32> to vector<16x16x128xf32>
    %c0_77 = arith.constant 0 : index
    %c0_78 = arith.constant 0 : index
    %c0_79 = arith.constant 0 : index
    %c0_80 = arith.constant 0 : index
    %121 = vector.load %arg8[%c0_77, %c0_78, %c0_79, %c0_80] : memref<1x16x16x128xf32, #tpu.memory_space<vmem>>, vector<1x16x16x128xf32>
    %122 = vector.shape_cast %121 : vector<1x16x16x128xf32> to vector<16x16x128xf32>
    %123 = vector.shape_cast %120 : vector<16x16x128xf32> to vector<1x16x16x128xf32>
    tpu.vector_store %arg8[%c0_77, %c0_78, %c0_79, %c0_80], %123 {strides = array<i32>} : memref<1x16x16x128xf32, #tpu.memory_space<vmem>>, vector<1x16x16x128xf32>,
    return
  }
  func.func @transform_0(%arg0: i32) -> (i32, i32, i32, i32) {
    %c0_i32 = arith.constant 0 : i32
    %c0_i32_0 = arith.constant 0 : i32
    %c0_i32_1 = arith.constant 0 : i32
    %c0_i32_2 = arith.constant 0 : i32
    return %arg0, %c0_i32, %c0_i32_0, %c0_i32_1 : i32, i32, i32, i32
  }
  func.func @transform_1(%arg0: i32) -> (i32, i32) {
    %c0_i32 = arith.constant 0 : i32
    %c0_i32_0 = arith.constant 0 : i32
    %c0_i32_1 = arith.constant 0 : i32
    return %c0_i32, %c0_i32_0 : i32, i32
  }
  func.func @transform_2(%arg0: i32) -> (i32, i32, i32, i32) {
    %c0_i32 = arith.constant 0 : i32
    %c0_i32_0 = arith.constant 0 : i32
    %c0_i32_1 = arith.constant 0 : i32
    %c0_i32_2 = arith.constant 0 : i32
    %c0_i32_3 = arith.constant 0 : i32
    return %c0_i32, %c0_i32_0, %c0_i32_1, %c0_i32_2 : i32, i32, i32, i32
  }
  func.func @transform_3(%arg0: i32) -> (i32, i32) {
    %c0_i32 = arith.constant 0 : i32
    %c0_i32_0 = arith.constant 0 : i32
    %c0_i32_1 = arith.constant 0 : i32
    return %c0_i32, %c0_i32_0 : i32, i32
  }
  func.func @transform_4(%arg0: i32) -> (i32, i32) {
    %c0_i32 = arith.constant 0 : i32
    %c0_i32_0 = arith.constant 0 : i32
    %c0_i32_1 = arith.constant 0 : i32
    return %c0_i32, %c0_i32_0 : i32, i32
  }
  func.func @transform_5(%arg0: i32) -> (i32, i32) {
    %c0_i32 = arith.constant 0 : i32
    %c0_i32_0 = arith.constant 0 : i32
    %c0_i32_1 = arith.constant 0 : i32
    return %c0_i32, %c0_i32_0 : i32, i32
  }
  func.func @transform_6(%arg0: i32) -> (i32, i32) {
    %c0_i32 = arith.constant 0 : i32
    %c0_i32_0 = arith.constant 0 : i32
    %c0_i32_1 = arith.constant 0 : i32
    return %c0_i32, %c0_i32_0 : i32, i32
  }
  func.func @transform_7(%arg0: i32) -> (i32, i32, i32, i32) {
    %c0_i32 = arith.constant 0 : i32
    %c0_i32_0 = arith.constant 0 : i32
    %c0_i32_1 = arith.constant 0 : i32
    %c0_i32_2 = arith.constant 0 : i32
    return %arg0, %c0_i32, %c0_i32_0, %c0_i32_1 : i32, i32, i32, i32
  }
}

</mosaic_0001>

<bundles_post_ra>
// kernel: tpu_custom_call.1
= control target key start
LH: loop header
LB: loop body
LE: loop exit
PB: predicated region body
PF: predicated region fallthrough
CT: control target
= control target key end

     0   :  { %12 = vsyncpa [#allocation3], 0  ;;  %s5806_s0 = inlined_call_operand.hbm [shape: f32[2,16,16,128], index: 0, kind: input, shape index: {}]   ;;  %s5807_s1 = inlined_call_operand.vmem [shape: bf16[128,32], index: 1, kind: input, shape index: {}]   ;;  %s5808_s2 = inlined_call_operand.hbm [shape: bf16[3,3,32,32], index: 2, kind: input, shape index: {}]   ;;  %s5809_s3 = inlined_call_operand.vmem [shape: bf16[32,128], index: 3, kind: input, shape index: {}]   ;;  %s5810_s4 = inlined_call_operand.vmem [shape: f32[1,32], index: 4, kind: input, shape index: {}]   ;;  %s5811_s5 = inlined_call_operand.vmem [shape: f32[1,32], index: 5, kind: input, shape index: {}]   ;;  %s5812_s6 = inlined_call_operand.vmem [shape: f32[1,128], index: 6, kind: input, shape index: {}]   ;;  %s5813_s7 = inlined_call_operand.hbm [shape: f32[2,16,16,128], index: 7, kind: output, shape index: {}]  }
   0x1   :  { %14 = vsyncpa [#allocation3 + $0x1], 0 }
   0x2   :  { %15 = vsyncpa [#allocation6], 0 }
   0x3   :  { %16 = vsyncpa [#allocation4], 0 }
   0x4   :  { %18 = vsyncpa [#allocation4 + $0x1], 0  ;;  %s4789_s24 = smov 0   ;;  %s4791_s25 = smov 0  }
   0x5   :  { %s4793_s26 = smov 0   ;;  %s4795_s27 = smov 0  }
   0x6 LB: > { %s4810_s28 = sadd.s32 4294967295, %s4736_s27   ;;  %s3404_s29 = sadd.s32 4294967294, %s4736_s27   ;;  %s4736_s27 = sphi %s4795_s27, %s5852_s27   ;;  %s4732_s26 = sphi %s4793_s26, %s5851_s26   ;;  %s4728_s25 = sphi %s4791_s25, %s5850_s25   ;;  %s4724_s24 = sphi %s4789_s24, %s5849_s24  }
   0x7   : > { %p44_p0 = scmp.ne.s32.totalorder %s4728_s25, %s4724_s24  ;;  %p5814_p1 = scmp.eq.s32.totalorder %s4810_s28, 0 }
   0x8   : > { %p200_p3 = scmp.eq.s32.totalorder %s3404_s29, 1  ;;  %p3405_p5 = scmp.ge.s32.totalorder %s4736_s27, 1 }
   0x9   : > { %p4819_p4 = por %p5814_p1, %p44_p0  ;;  %p207_p7 = scmp.lt.s32.totalorder %s4736_s27, 3 }
   0xa   : > { %p4824_p6 = por %p200_p3, %p44_p0  ;;  %s4738_s10 = smov [#allocation5]  }
   0xb   : > { %s5824_s30 = scalar_select %p4819_p4, 1, 0 }
   0xc   : > { %s5825_s8 = scalar_select %p4824_p6, 1, 0 }
   0xd   : > { %p4829_p8 = pnand %p3405_p5, %p207_p7  ;;  %s222_s11 = sshll.u32 %s4738_s10, 4  ;;  %s4833_s11 = int_to_ptr.vmem [resolvable:$true] %s222_s11 }
   0xe   : > { %s4845_s13 = sadd.s32 1, %s4736_s27   ;;  %s31_s14 = sadd.s32 1, %s4732_s26 }
   0xf   : > { %s5826_s9 = scalar_select %p4829_p8, 1, 0 }
  0x10   : > { %p4491_p9 = pneg %p4829_p8  ;;  %s28_s15 = ssub.s32 %s4736_s27, %s4845_s13 }
  0x11   : > { %s4608_s18 = scalar_lea.hbm %s5808_s2, 2304 }
  0x12   : > { %p4840_p11 = pnand %p4491_p9, %p5814_p1  ;;  %p4609_p12 = scmp.ne.s32.totalorder %s5808_s2, %s4608_s18 }
  0x13   : > { %p4615_p5 = scmp.lt.u32.totalorder %s4608_s18, %s5808_s2 }
  0x14   : > { %p4610_p13 = pneg %p4840_p11 }
  0x16   : > { %p4611_p0 = pnand %p4610_p13, %p4609_p12 }
  0x18   : > { %p4612_p3 = pneg %p4611_p0 }
  0x1a   : > { %p4617_p7 = pnand %p4615_p5, %p4612_p3 }
  0x1c   : > { %4620 = shalt.err (!%p4617_p7)
}
  0x1d   : > { %s4621_s23 = scalar_lea.vmem %s4833_s11, 2304  ;;  %p4629_p2 = scmp.lt.s32.totalorder %s4833_s11, %s4833_s11 }
  0x1e   : > { %p4622_p9 = scmp.ne.s32.totalorder %s4833_s11, %s4621_s23  ;;  %p4630_p6 = scmp.lt.s32.totalorder %s4621_s23, %s4621_s23 }
  0x20   : > { %p4624_p10 = pnand %p4622_p9, %p4610_p13  ;;  %p4631_p4 = por %p4630_p6, %p4629_p2 }
  0x22   : > { %p4625_p1 = pneg %p4624_p10 }
  0x24   : > { %p4632_p8 = pnand %p4631_p4, %p4625_p1 }
  0x26   : > { %4635 = shalt.err (!%p4632_p8)
}
  0x27   : > { %s4739_s29 = smov 64   ;;  %s4740_s10 = smov 4  }
  0x28   : > { %4494 = dma.hbm_to_vmem [thread:$0]  (!%p4840_p11), %s5808_s2, 2304, %s4833_s11, [#allocation6], %s4739_s29, %s4739_s29, %s4740_s10  }
  0x29   : > { %p29_p2 = scmp.eq.s32.totalorder %s28_s15, 0  ;;  %p38_p1 = scmp.ne.s32.totalorder %s4732_s26, %s4728_s25 }
  0x2a   : > { %p39_p4 = scmp.eq.s32.totalorder %s4736_s27, 0  ;;  %p4504_p6 = scmp.lt.s32.totalorder %s4736_s27, 2 }
  0x2b   : > { %s4876_s18 = scalar_select %p29_p2, %s4732_s26, %s31_s14  }
  0x2c   : > { %p40_p8 = por %p39_p4, %p38_p1  ;;  %p5828_p10 = scmp.eq.s32.totalorder %s4810_s28, 1 }
  0x2d   : > { %s248_s20 = sand.u32 1, %s4732_s26   ;;  %s3609_s21 = sshll.u32 %s4736_s27, 12 }
  0x2e   : > { %p4880_p12 = por %p5828_p10, %p38_p1  ;;  %s3408_s22 = sshll.u32 %s248_s20, 8 }
  0x2f   : > { %s4889_s16 = scalar_lea.hbm %s5806_s0, %s3609_s21  ;;  %s252_s11 = scalar_lea.vmem [#allocation2], %s3408_s22 }
  0x30   : > { %s259_s14 = sshll.u32 %s252_s11, 4  ;;  %p4891_p11 = pnand %p4504_p6, %p40_p8  ;;  %s4895_s14 = int_to_ptr.vmem [resolvable:$true] %s259_s14 }
  0x31   : > { %s4897_s29 = scalar_lea.sflag [#allocation3], %s248_s20  ;;  %s4636_s10 = scalar_lea.hbm %s4889_s16, 4096 }
  0x32   : > { %p4637_p13 = scmp.ne.s32.totalorder %s4889_s16, %s4636_s10  ;;  %p4638_p0 = pneg %p4891_p11 }
  0x33   : > { %s4641_s22 = scalar_lea.hbm %s5806_s0, 8192  ;;  %p4642_p7 = scmp.lt.u32.totalorder %s4889_s16, %s5806_s0 }
  0x34   : > { %p4639_p3 = pnand %p4638_p0, %p4637_p13  ;;  %p4643_p9 = scmp.lt.u32.totalorder %s4641_s22, %s4636_s10 }
  0x35   : > { %p4645_p1 = scmp.lt.u32.totalorder %s4636_s10, %s4889_s16 }
  0x36   : > { %p4640_p5 = pneg %p4639_p3  ;;  %p4644_p2 = por %p4643_p9, %p4642_p7 }
  0x38   : > { %p4646_p4 = por %p4645_p1, %p4644_p2 }
  0x3a   : > { %p4647_p6 = pnand %p4646_p4, %p4640_p5 }
  0x3c   : > { %4650 = shalt.err (!%p4647_p6)
}
  0x3d   : > { %s4651_s20 = scalar_lea.vmem %s4895_s14, 4096  ;;  %s4741_s11 = smov [#allocation2]  }
  0x3e   : > { %p4652_p8 = scmp.ne.s32.totalorder %s4895_s14, %s4651_s20  ;;  %s4656_s17 = sshll.u32 %s4741_s11, 4  ;;  %s4657_s17 = int_to_ptr.vmem [resolvable:$false] %s4656_s17 }
  0x3f   : > { %s4658_s21 = scalar_lea.vmem %s4657_s17, 8192  ;;  %p4659_p3 = scmp.lt.s32.totalorder %s4895_s14, %s4657_s17 }
  0x40   : > { %p4654_p10 = pnand %p4652_p8, %p4638_p0  ;;  %p4660_p7 = scmp.lt.s32.totalorder %s4658_s21, %s4651_s20 }
  0x42   : > { %p4655_p13 = pneg %p4654_p10  ;;  %p4661_p9 = por %p4660_p7, %p4659_p3 }
  0x44   : > { %p4662_p2 = pnand %p4661_p9, %p4655_p13 }
  0x46   : > { %4665 = shalt.err (!%p4662_p2)
}
  0x47   : > { %s4742_s10 = smov 128   ;;  %s4743_s22 = smov 8  }
  0x48   : > { %4498 = dma.hbm_to_vmem [thread:$0]  (!%p4891_p11), %s4889_s16, 4096, %s4895_s14, %s4897_s29, %s4742_s10, %s4742_s10, %s4743_s22  }
  0x49   : > { %p5831_p0 = scmp.ne.s32.totalorder %s5826_s9, 0 }
  0x4b   : > { %271 = sbr.rel (%p5831_p0) target bundleno = 1183 (0x49f), region = 48 }
  0x52   : > { %s4928_s12 = sand.u32 1, %s4728_s25   ;;  %p5832_p5 = scmp.ne.s32.totalorder %s5824_s30, 0 }
  0x53   : > { %s3412_s23 = sshll.u32 %s4928_s12, 8  ;;  %s274_s20 = scalar_lea.sflag [#allocation3], %s4928_s12 }
  0x54   : > { %s4934_s11 = scalar_lea.vmem [#allocation2], %s3412_s23 }
  0x55   : > { %4711 = dma.done.wait (%p5832_p5), %s274_s20, 4096  }
  0x56   : > { %4713 = vsyncadd (%p5832_p5), %s274_s20, 4294963200  ;;  %p5833_p11 = scmp.eq.s32.totalorder %s4810_s28, 0 }
  0x58   : > { %4715 = dma.done.wait (%p5833_p11), [#allocation6], 2304   ;;  %p5834_p1 = pmov %p5833_p11 }
  0x59   : > { %v4548_v0 = vld [vmem:[%s5807_s1] sm:$0xff]   ;;  %v4549_v1 = vld [vmem:[%s5807_s1 + $0x8] sm:$0xff]   ;;  %v4550_v2 = vld [vmem:[%s5807_s1 + $0x10] sm:$0xff]   ;;  %v5817_v58 = vmov 0.0|0.0   ;;  %vm656_vm0 = vcmask 1040384   ;;  %vm1236_vm1 = vcmask 1046528  }
  0x5a   : > { %4717 = vsyncadd (%p5834_p1), [#allocation6], 4294964992  ;;  %3815 = vmatprep.subr.bf16.mxu0 %v4548_v0  ;;  %v4551_v3 = vld [vmem:[%s5807_s1 + $0x18] sm:$0xff]   ;;  %v313_v4 = vld [vmem:[%s4934_s11] sm:$0xff]  ;;  %vm805_vm2 = vcmask 261120   ;;  %s5665_s30 = scalar_lea.vmem [#allocation7], %s3412_s23 }
  0x5b   : > { %3816 = vmatpush3.bf16.msra.mxu0 %v4548_v0  ;;  %v314_v5 = vld [vmem:[%s4934_s11 + $0x8] sm:$0xff]  ;;  %v4552_v7 = vld [vmem:[%s5807_s1 + $0x20] sm:$0xff]   ;;  %v4554_v9 = vld [vmem:[%s5807_s1 + $0x30] sm:$0xff]   ;;  %s3610_s23 = sshll.u32 %s4810_s28, 12  ;;  %s3321_s29 = sshll.u32 %s5665_s30, 4  ;;  %s5759_s29 = int_to_ptr.vmem [resolvable:$true] %s3321_s29 }
  0x5c   : > { %3817 = vmatprep.subr.bf16.mxu0 %v4549_v1  ;;  %v345_v6 = vpack.c.bf16 %v314_v5, %v313_v4  ;;  %v4553_v8 = vld [vmem:[%s5807_s1 + $0x28] sm:$0xff]   ;;  %v4555_v10 = vld [vmem:[%s5807_s1 + $0x38] sm:$0xff]   ;;  %v315_v11 = vld [vmem:[%s4934_s11 + $0x10] sm:$0xff]  ;;  %s5757_s10 = scalar_lea.hbm %s5813_s7, %s3610_s23  ;;  %s3308_s28 = scalar_lea.sflag [#allocation4], %s4928_s12 }
  0x5d   : > { %v316_v12 = vld [vmem:[%s4934_s11 + $0x18] sm:$0xff]  ;;  %v317_v13 = vld [vmem:[%s4934_s11 + $0x20] sm:$0xff]  ;;  %v318_v14 = vld [vmem:[%s4934_s11 + $0x28] sm:$0xff]  ;;  %s4666_s22 = scalar_lea.vmem %s5759_s29, 4096 }
  0x5e   : > { %3831 = vmatprep.mubr.bf16.mxu0 %v345_v6  ;;  %v346_v15 = vpack.c.bf16 %v316_v12, %v315_v11  ;;  %v347_v16 = vpack.c.bf16 %v318_v14, %v317_v13  ;;  %v319_v17 = vld [vmem:[%s4934_s11 + $0x30] sm:$0xff]  ;;  %v320_v18 = vld [vmem:[%s4934_s11 + $0x38] sm:$0xff]  ;;  %v321_v19 = vld [vmem:[%s4934_s11 + $0x40] sm:$0xff]  ;;  %p4667_p4 = scmp.ne.s32.totalorder %s5759_s29, %s4666_s22 }
  0x5f   : > { %3818 = vmatpush3.bf16.msra.mxu0 %v4549_v1  ;;  %v322_v20 = vld [vmem:[%s4934_s11 + $0x48] sm:$0xff]  ;;  %v348_v21 = vpack.c.bf16 %v320_v18, %v319_v17  ;;  %v323_v23 = vld [vmem:[%s4934_s11 + $0x50] sm:$0xff]  ;;  %v324_v24 = vld [vmem:[%s4934_s11 + $0x58] sm:$0xff] }
  0x60   : > { %3819 = vmatprep.subr.bf16.mxu0 %v4550_v2  ;;  %v349_v22 = vpack.c.bf16 %v322_v20, %v321_v19  ;;  %v325_v25 = vld [vmem:[%s4934_s11 + $0x60] sm:$0xff]  ;;  %v326_v26 = vld [vmem:[%s4934_s11 + $0x68] sm:$0xff]  ;;  %v350_v27 = vpack.c.bf16 %v324_v24, %v323_v23  ;;  %v327_v29 = vld [vmem:[%s4934_s11 + $0x70] sm:$0xff]  ;;  %p4668_p6 = pnand %p4667_p4, %p4880_p12 }
  0x61   : > { %v351_v28 = vpack.c.bf16 %v326_v26, %v325_v25  ;;  %v328_v30 = vld [vmem:[%s4934_s11 + $0x78] sm:$0xff]  ;;  %v329_v31 = vld [vmem:[%s4934_s11 + $0x80] sm:$0xff]  ;;  %v330_v32 = vld [vmem:[%s4934_s11 + $0x88] sm:$0xff] }
  0x62   : > { %v352_v33 = vpack.c.bf16 %v328_v30, %v327_v29  ;;  %v353_v34 = vpack.c.bf16 %v330_v32, %v329_v31  ;;  %v331_v35 = vld [vmem:[%s4934_s11 + $0x90] sm:$0xff]  ;;  %v332_v36 = vld [vmem:[%s4934_s11 + $0x98] sm:$0xff]  ;;  %v333_v37 = vld [vmem:[%s4934_s11 + $0xa0] sm:$0xff]  ;;  %p4669_p8 = pneg %p4668_p6 }
  0x63   : > { %3820 = vmatpush3.bf16.msra.mxu0 %v4550_v2  ;;  %v334_v38 = vld [vmem:[%s4934_s11 + $0xa8] sm:$0xff]  ;;  %v354_v39 = vpack.c.bf16 %v332_v36, %v331_v35  ;;  %v335_v41 = vld [vmem:[%s4934_s11 + $0xb0] sm:$0xff]  ;;  %v336_v42 = vld [vmem:[%s4934_s11 + $0xb8] sm:$0xff] }
  0x64   : > { %3821 = vmatprep.subr.bf16.mxu0 %v4551_v3  ;;  %v355_v40 = vpack.c.bf16 %v334_v38, %v333_v37  ;;  %v337_v43 = vld [vmem:[%s4934_s11 + $0xc0] sm:$0xff]  ;;  %v338_v44 = vld [vmem:[%s4934_s11 + $0xc8] sm:$0xff]  ;;  %v356_v45 = vpack.c.bf16 %v336_v42, %v335_v41  ;;  %v339_v47 = vld [vmem:[%s4934_s11 + $0xd0] sm:$0xff] }
  0x65   : > { %v357_v46 = vpack.c.bf16 %v338_v44, %v337_v43  ;;  %v340_v48 = vld [vmem:[%s4934_s11 + $0xd8] sm:$0xff]  ;;  %v341_v49 = vld [vmem:[%s4934_s11 + $0xe0] sm:$0xff]  ;;  %v342_v50 = vld [vmem:[%s4934_s11 + $0xe8] sm:$0xff] }
  0x66   : > { %v358_v51 = vpack.c.bf16 %v340_v48, %v339_v47  ;;  %v359_v52 = vpack.c.bf16 %v342_v50, %v341_v49  ;;  %v343_v53 = vld [vmem:[%s4934_s11 + $0xf0] sm:$0xff]  ;;  %v344_v54 = vld [vmem:[%s4934_s11 + $0xf8] sm:$0xff]  ;;  %v5009_v61 = vld [vmem:[#allocation5 + $0x40] sm:$0xff]  }
  0x67   : > { %3822 = vmatpush3.bf16.msra.mxu0 %v4551_v3  ;;  %v360_v55 = vpack.c.bf16 %v344_v54, %v343_v53  ;;  %v4556_v56 = vld [vmem:[#allocation5 + $0x10] sm:$0xff]   ;;  %v4557_v57 = vld [vmem:[#allocation5 + $0x18] sm:$0xff]   ;;  %v4562_v62 = vld [vmem:[#allocation5] sm:$0xff]  }
  0x68   : > { %3823 = vmatprep.subr.bf16.mxu0 %v4552_v7  ;;  %v5001_v59 = vld [vmem:[#allocation5 + $0x30] sm:$0xff]   ;;  %v5005_v60 = vld [vmem:[#allocation5 + $0x38] sm:$0xff]   ;;  %v5015_v63 = vld [vmem:[%s5810_s4] ss:$0 sm:$0xff] }
  0x69   : > { %4223 = vmatprep.subr.bf16.mxu1 %v5001_v59  ;;  %v4563_v24 = vld [vmem:[#allocation5 + $0x8] sm:$0xff]   ;;  %v5044_v42 = vld [vmem:[#allocation5 + $0x20] sm:$0xff]  }
  0x6a   : > { %4225 = vmatpush3.bf16.msra.mxu1 %v5001_v59 }
  0x6b   : > { %3824 = vmatpush3.bf16.msra.mxu0 %v4552_v7  ;;  %4224 = vmatprep.subr.bf16.mxu1 %v5005_v60 }
  0x6c   : > { %3825 = vmatprep.subr.bf16.mxu0 %v4553_v8 }
  0x6e   : > { %4226 = vmatpush3.bf16.msra.mxu1 %v5005_v60 }
  0x6f   : > { %3826 = vmatpush3.bf16.msra.mxu0 %v4553_v8  ;;  %4007 = vmatprep.subr.bf16.mxu1 %v5009_v61 }
  0x70   : > { %3827 = vmatprep.subr.bf16.mxu0 %v4554_v9 }
  0x73   : > { %3828 = vmatpush3.bf16.msra.mxu0 %v4554_v9 }
  0x74   : > { %3829 = vmatprep.subr.bf16.mxu0 %v4555_v10 }
  0x77   : > { %3830 = vmatpush3.bf16.msra.mxu0 %v4555_v10 }
  0x78   : > { %3863 = vmatprep.subr.bf16.mxu0 %v4556_v56 }
  0x7a   : > { %3832 = vmatmul.mubr.bf16.vlgmr.msra.gmra.mrb[0].mxu0 %v346_v15 }
  0x7b   : > { %3835 = vmatprep.mubr.bf16.mxu0 %v347_v16  ;;  %3864 = vmatpush3.bf16.msra.mxu0 %v4556_v56 }
  0x7c   : > { %3865 = vmatprep.subr.bf16.mxu0 %v4557_v57 }
  0x7f   : > { %3866 = vmatpush3.bf16.msra.mxu0 %v4557_v57 }
  0x80   : > { %3899 = vmatprep.subr.bf16.mxu0 %v4562_v62 }
  0x82   : > { %3836 = vmatmul.mubr.bf16.gmra.mrb[4].mxu0 %v348_v21 }
  0x83   : > { %3839 = vmatprep.mubr.bf16.mxu0 %v349_v22 }
  0x8a   : > { %3840 = vmatmul.mubr.bf16.gmra.mrb[8].mxu0 %v350_v27 }
  0x8b   : > { %3843 = vmatprep.mubr.bf16.mxu0 %v351_v28 }
  0x92   : > { %3844 = vmatmul.mubr.bf16.gmra.mrb[12].mxu0 %v352_v33 }
  0x93   : > { %3847 = vmatprep.mubr.bf16.mxu0 %v353_v34 }
  0x9a   : > { %3848 = vmatmul.mubr.bf16.gmra.mrb[16].mxu0 %v354_v39 }
  0x9b   : > { %3851 = vmatprep.mubr.bf16.mxu0 %v355_v40 }
  0xa2   : > { %3852 = vmatmul.mubr.bf16.gmra.mrb[20].mxu0 %v356_v45 }
  0xa3   : > { %3855 = vmatprep.mubr.bf16.mxu0 %v357_v46 }
  0xaa   : > { %3856 = vmatmul.mubr.bf16.gmra.mrb[24].mxu0 %v358_v51 }
  0xab   : > { %3859 = vmatprep.mubr.bf16.mxu0 %v359_v52 }
  0xb2   : > { %3860 = vmatmul.mubr.bf16.gmra.mrb[28].mxu0 %v360_v55 }
  0xb3   : > { %3867 = vmatprep.mubr.bf16.mxu0 %v5817_v58 }
 0x14d   : > { %v3833_v0 = vpop.f32.mrb[0].mxu0 }
 0x14e   : > { %v475_v1 = vadd.f32 %v3833_v0, %v5015_v63  ;;  %v466_v2 = vpop.f32.mrb[1].mxu0 }
 0x14f   : > { %v467_v3 = vadd.f32 %v5015_v63, %v466_v2  ;;  %v3834_v4 = vpop.f32.mrb[2].mxu0 }
 0x150   : > { %v595_v5 = vmax.f32 %v475_v1, 0.0  ;;  %v478_v6 = vadd.f32 %v3834_v4, %v5015_v63  ;;  %v469_v7 = vpop.f32.mrb[3].mxu0 }
 0x151   : > { %v593_v8 = vmax.f32 %v467_v3, 0.0  ;;  %v470_v9 = vadd.f32 %v5015_v63, %v469_v7 }
 0x152   : > { %v662_v10 = vrot.slane %v595_v5, 7  ;;  %v596_v11 = vmax.f32 %v478_v6, 0.0  ;;  %v1242_v12 = vrot.slane %v595_v5, 1 }
 0x153   : > { %v659_v13 = vrot.slane %v593_v8, 7  ;;  %v594_v14 = vmax.f32 %v470_v9, 0.0  ;;  %v1239_v15 = vrot.slane %v593_v8, 1 }
 0x154   : > { %v663_v16 = vrot.slane %v596_v11, 7  ;;  %v5021_v17 = vpack.c.bf16 %v596_v11, %v595_v5  ;;  %v1243_v18 = vrot.slane %v596_v11, 1  ;;  %v738_v19 = vsel %vm656_vm0, 0.0, %v662_v10 }
 0x155   : > { %v660_v20 = vrot.slane %v594_v14, 7  ;;  %v5024_v21 = vpack.c.bf16 %v594_v14, %v593_v8  ;;  %v1240_v22 = vrot.slane %v594_v14, 1  ;;  %v3837_v23 = vpop.f32.mrb[4].mxu0  ;;  %v737_v25 = vsel %vm656_vm0, 0.0, %v659_v13 }
 0x156   : > { %v1318_v26 = vsel %vm1236_vm1, %v1243_v18, 0.0  ;;  %v491_v27 = vadd.f32 %v3837_v23, %v5015_v63  ;;  %v482_v28 = vpop.f32.mrb[5].mxu0  ;;  %v664_v29 = vsel %vm656_vm0, %v662_v10, %v663_v16  ;;  %v1244_v47 = vsel %vm1236_vm1, %v1242_v12, %v1243_v18 }
 0x157   : > { %v661_v30 = vsel %vm656_vm0, %v659_v13, %v660_v20  ;;  %v1317_v31 = vsel %vm1236_vm1, %v1240_v22, 0.0  ;;  %v483_v32 = vadd.f32 %v5015_v63, %v482_v28  ;;  %v3838_v33 = vpop.f32.mrb[6].mxu0  ;;  %3868 = vmatmul.mubr.msk.bf16.vlgmr.msra.gmra.mrb[32].mxu0 %vm805_vm2, %v5024_v21  ;;  %v5035_v34 = vpack.c.bf16 %v664_v29, %v738_v19 }
 0x158   : > { %v5037_v35 = vpack.c.bf16 %v661_v30, %v737_v25  ;;  %v599_v36 = vmax.f32 %v491_v27, 0.0  ;;  %v494_v37 = vadd.f32 %v3838_v33, %v5015_v63  ;;  %v485_v38 = vpop.f32.mrb[7].mxu0  ;;  %3871 = vmatprep.mubr.msk.bf16.mxu0 %vm805_vm2, %v5021_v17  ;;  %3900 = vmatpush3.bf16.msra.mxu0 %v4562_v62  ;;  %v1241_v39 = vsel %vm1236_vm1, %v1239_v15, %v1240_v22 }
 0x159   : > { %v597_v40 = vmax.f32 %v483_v32, 0.0  ;;  %v486_v41 = vadd.f32 %v5015_v63, %v485_v38  ;;  %3901 = vmatprep.subr.bf16.mxu0 %v4563_v24  ;;  %v5046_v43 = vpack.c.bf16 %v1317_v31, %v1241_v39  ;;  %v5049_v51 = vpack.c.bf16 %v1318_v26, %v1244_v47 }
 0x15a   : > { %v668_v44 = vrot.slane %v599_v36, 7  ;;  %v1248_v45 = vrot.slane %v599_v36, 1  ;;  %v600_v46 = vmax.f32 %v494_v37, 0.0 }
 0x15b   : > { %v665_v48 = vrot.slane %v597_v40, 7  ;;  %v1245_v49 = vrot.slane %v597_v40, 1  ;;  %v598_v50 = vmax.f32 %v486_v41, 0.0 }
 0x15c   : > { %v740_v52 = vsel %vm656_vm0, 0.0, %v668_v44  ;;  %v669_v53 = vrot.slane %v600_v46, 7  ;;  %v5052_v54 = vpack.c.bf16 %v600_v46, %v599_v36  ;;  %v1249_v55 = vrot.slane %v600_v46, 1  ;;  %3902 = vmatpush3.bf16.msra.mxu0 %v4563_v24 }
 0x15d   : > { %v739_v56 = vsel %vm656_vm0, 0.0, %v665_v48  ;;  %v666_v57 = vrot.slane %v598_v50, 7  ;;  %v5055_v62 = vpack.c.bf16 %v598_v50, %v597_v40  ;;  %v1246_v0 = vrot.slane %v598_v50, 1  ;;  %v3841_v1 = vpop.f32.mrb[8].mxu0  ;;  %3935 = vmatprep.subr.bf16.mxu0 %v5044_v42 }
 0x15e   : > { %v1320_v2 = vsel %vm1236_vm1, %v1249_v55, 0.0  ;;  %v507_v3 = vadd.f32 %v3841_v1, %v5015_v63  ;;  %v498_v4 = vpop.f32.mrb[9].mxu0  ;;  %v670_v5 = vsel %vm656_vm0, %v668_v44, %v669_v53  ;;  %v1250_v6 = vsel %vm1236_vm1, %v1248_v45, %v1249_v55 }
 0x15f   : > { %v1319_v7 = vsel %vm1236_vm1, %v1246_v0, 0.0  ;;  %v499_v8 = vadd.f32 %v5015_v63, %v498_v4  ;;  %v3842_v9 = vpop.f32.mrb[10].mxu0  ;;  %3872 = vmatmul.mubr.msk.bf16.gmra.mrb[36].mxu0 %vm805_vm2, %v5055_v62  ;;  %v667_v10 = vsel %vm656_vm0, %v665_v48, %v666_v57  ;;  %v5067_v11 = vpack.c.bf16 %v670_v5, %v740_v52 }
 0x160   : > { %v603_v12 = vmax.f32 %v507_v3, 0.0  ;;  %v510_v13 = vadd.f32 %v3842_v9, %v5015_v63  ;;  %v501_v14 = vpop.f32.mrb[11].mxu0  ;;  %3875 = vmatprep.mubr.msk.bf16.mxu0 %vm805_vm2, %v5052_v54  ;;  %v5072_v15 = vpack.c.bf16 %v667_v10, %v739_v56  ;;  %v1247_v16 = vsel %vm1236_vm1, %v1245_v49, %v1246_v0  ;;  %v4561_v3 = vld [vmem:[#allocation5 + $0x48] sm:$0xff]  }
 0x161   : > { %v601_v18 = vmax.f32 %v499_v8, 0.0  ;;  %v502_v19 = vadd.f32 %v5015_v63, %v501_v14  ;;  %v5076_v20 = vpack.c.bf16 %v1319_v7, %v1247_v16  ;;  %v5078_v22 = vpack.c.bf16 %v1320_v2, %v1250_v6 }
 0x162   : > { %v674_v23 = vrot.slane %v603_v12, 7  ;;  %v604_v24 = vmax.f32 %v510_v13, 0.0  ;;  %v1254_v25 = vrot.slane %v603_v12, 1 }
 0x163   : > { %v671_v26 = vrot.slane %v601_v18, 7  ;;  %v1251_v27 = vrot.slane %v601_v18, 1  ;;  %v602_v28 = vmax.f32 %v502_v19, 0.0 }
 0x164   : > { %v742_v29 = vsel %vm656_vm0, 0.0, %v674_v23  ;;  %v675_v30 = vrot.slane %v604_v24, 7  ;;  %v5081_v31 = vpack.c.bf16 %v604_v24, %v603_v12  ;;  %v1255_v32 = vrot.slane %v604_v24, 1 }
 0x165   : > { %v672_v33 = vrot.slane %v602_v28, 7  ;;  %v5083_v36 = vpack.c.bf16 %v602_v28, %v601_v18  ;;  %v1252_v37 = vrot.slane %v602_v28, 1  ;;  %v3845_v38 = vpop.f32.mrb[12].mxu0  ;;  %v741_v39 = vsel %vm656_vm0, 0.0, %v671_v26 }
 0x166   : > { %v1322_v40 = vsel %vm1236_vm1, %v1255_v32, 0.0  ;;  %v523_v41 = vadd.f32 %v3845_v38, %v5015_v63  ;;  %v514_v44 = vpop.f32.mrb[13].mxu0  ;;  %v676_v45 = vsel %vm656_vm0, %v674_v23, %v675_v30  ;;  %v1256_v46 = vsel %vm1236_vm1, %v1254_v25, %v1255_v32 }
 0x167   : > { %v1321_v47 = vsel %vm1236_vm1, %v1252_v37, 0.0  ;;  %v515_v48 = vadd.f32 %v5015_v63, %v514_v44  ;;  %v3846_v49 = vpop.f32.mrb[14].mxu0  ;;  %3876 = vmatmul.mubr.msk.bf16.gmra.mrb[40].mxu0 %vm805_vm2, %v5083_v36  ;;  %v673_v50 = vsel %vm656_vm0, %v671_v26, %v672_v33  ;;  %v5095_v52 = vpack.c.bf16 %v676_v45, %v742_v29 }
 0x168   : > { %v607_v53 = vmax.f32 %v523_v41, 0.0  ;;  %v526_v55 = vadd.f32 %v3846_v49, %v5015_v63  ;;  %v517_v56 = vpop.f32.mrb[15].mxu0  ;;  %3879 = vmatprep.mubr.msk.bf16.mxu0 %vm805_vm2, %v5081_v31  ;;  %v5100_v57 = vpack.c.bf16 %v673_v50, %v741_v39  ;;  %v1253_v0 = vsel %vm1236_vm1, %v1251_v27, %v1252_v37  ;;  %v5119_v27 = vld [vmem:[#allocation5 + $0x50] sm:$0xff]  }
 0x169   : > { %v605_v1 = vmax.f32 %v515_v48, 0.0  ;;  %v518_v2 = vadd.f32 %v5015_v63, %v517_v56  ;;  %v5104_v4 = vpack.c.bf16 %v1321_v47, %v1253_v0  ;;  %v5106_v5 = vpack.c.bf16 %v1322_v40, %v1256_v46 }
 0x16a   : > { %v680_v6 = vrot.slane %v607_v53, 7  ;;  %v608_v7 = vmax.f32 %v526_v55, 0.0  ;;  %3983 = vmatprep.mubr.msk.bf16.mxu1 %vm805_vm2, %v5100_v57  ;;  %v1260_v8 = vrot.slane %v607_v53, 1 }
 0x16b   : > { %v677_v9 = vrot.slane %v605_v1, 7  ;;  %v1257_v10 = vrot.slane %v605_v1, 1  ;;  %v606_v12 = vmax.f32 %v518_v2, 0.0  ;;  %3984 = vmatmul.mubr.msk.bf16.vlgmr.msra.gmra.mrb[0].mxu1 %vm805_vm2, %v5095_v52 }
 0x16c   : > { %v744_v13 = vsel %vm656_vm0, 0.0, %v680_v6  ;;  %v681_v14 = vrot.slane %v608_v7, 7  ;;  %v5113_v16 = vpack.c.bf16 %v608_v7, %v607_v53  ;;  %v1261_v18 = vrot.slane %v608_v7, 1  ;;  %4008 = vmatpush3.bf16.msra.mxu1 %v5009_v61 }
 0x16d   : > { %v743_v19 = vsel %vm656_vm0, 0.0, %v677_v9  ;;  %v678_v23 = vrot.slane %v606_v12, 7  ;;  %v5117_v24 = vpack.c.bf16 %v606_v12, %v605_v1  ;;  %v1258_v25 = vrot.slane %v606_v12, 1  ;;  %v3849_v26 = vpop.f32.mrb[16].mxu0  ;;  %4009 = vmatprep.subr.bf16.mxu1 %v4561_v3 }
 0x16e   : > { %v1324_v28 = vsel %vm1236_vm1, %v1261_v18, 0.0  ;;  %v539_v29 = vadd.f32 %v3849_v26, %v5015_v63  ;;  %v530_v30 = vpop.f32.mrb[17].mxu0  ;;  %v682_v32 = vsel %vm656_vm0, %v680_v6, %v681_v14  ;;  %v1262_v33 = vsel %vm1236_vm1, %v1260_v8, %v1261_v18 }
 0x16f   : > { %v1323_v61 = vsel %vm1236_vm1, %v1258_v25, 0.0  ;;  %v531_v37 = vadd.f32 %v5015_v63, %v530_v30  ;;  %v3850_v38 = vpop.f32.mrb[18].mxu0  ;;  %3880 = vmatmul.mubr.msk.bf16.gmra.mrb[44].mxu0 %vm805_vm2, %v5117_v24  ;;  %v679_v39 = vsel %vm656_vm0, %v677_v9, %v678_v23  ;;  %v5130_v40 = vpack.c.bf16 %v682_v32, %v744_v13 }
 0x170   : > { %v611_v41 = vmax.f32 %v539_v29, 0.0  ;;  %v542_v44 = vadd.f32 %v3850_v38, %v5015_v63  ;;  %v533_v45 = vpop.f32.mrb[19].mxu0  ;;  %3883 = vmatprep.mubr.msk.bf16.mxu0 %vm805_vm2, %v5113_v16  ;;  %v5135_v46 = vpack.c.bf16 %v679_v39, %v743_v19  ;;  %4010 = vmatpush3.bf16.msra.mxu1 %v4561_v3  ;;  %v1259_v47 = vsel %vm1236_vm1, %v1257_v10, %v1258_v25 }
 0x171   : > { %v609_v48 = vmax.f32 %v531_v37, 0.0  ;;  %v534_v49 = vadd.f32 %v5015_v63, %v533_v45  ;;  %4043 = vmatprep.subr.bf16.mxu1 %v5119_v27  ;;  %v5140_v50 = vpack.c.bf16 %v1323_v61, %v1259_v47  ;;  %v5142_v53 = vpack.c.bf16 %v1324_v28, %v1262_v33 }
 0x172   : > { %v686_v55 = vrot.slane %v611_v41, 7  ;;  %v612_v56 = vmax.f32 %v542_v44, 0.0  ;;  %3987 = vmatprep.mubr.msk.bf16.mxu1 %vm805_vm2, %v5135_v46  ;;  %v1266_v0 = vrot.slane %v611_v41, 1 }
 0x173   : > { %5835 = vst [vmem:[#allocation11_spill] sm:$0xff] %v5142_v53  ;;  %v683_v1 = vrot.slane %v609_v48, 7  ;;  %v1263_v2 = vrot.slane %v609_v48, 1  ;;  %v610_v3 = vmax.f32 %v534_v49, 0.0  ;;  %3988 = vmatmul.mubr.msk.bf16.gmra.mrb[4].mxu1 %vm805_vm2, %v5130_v40 }
 0x174   : > { %v746_v6 = vsel %vm656_vm0, 0.0, %v686_v55  ;;  %v687_v7 = vrot.slane %v612_v56, 7  ;;  %v5149_v8 = vpack.c.bf16 %v612_v56, %v611_v41  ;;  %v1267_v9 = vrot.slane %v612_v56, 1 }
 0x175   : > { %v745_v10 = vsel %vm656_vm0, 0.0, %v683_v1  ;;  %v684_v12 = vrot.slane %v610_v3, 7  ;;  %v5152_v13 = vpack.c.bf16 %v610_v3, %v609_v48  ;;  %v1264_v14 = vrot.slane %v610_v3, 1  ;;  %v3853_v18 = vpop.f32.mrb[20].mxu0 }
 0x176   : > { %v1326_v19 = vsel %vm1236_vm1, %v1267_v9, 0.0  ;;  %v555_v23 = vadd.f32 %v3853_v18, %v5015_v63  ;;  %v546_v25 = vpop.f32.mrb[21].mxu0  ;;  %v688_v26 = vsel %vm656_vm0, %v686_v55, %v687_v7  ;;  %v1268_v28 = vsel %vm1236_vm1, %v1266_v0, %v1267_v9 }
 0x177   : > { %v1325_v29 = vsel %vm1236_vm1, %v1264_v14, 0.0  ;;  %v547_v30 = vadd.f32 %v5015_v63, %v546_v25  ;;  %v3854_v32 = vpop.f32.mrb[22].mxu0  ;;  %3884 = vmatmul.mubr.msk.bf16.gmra.mrb[48].mxu0 %vm805_vm2, %v5152_v13  ;;  %v685_v33 = vsel %vm656_vm0, %v683_v1, %v684_v12  ;;  %v5163_v61 = vpack.c.bf16 %v688_v26, %v746_v6 }
 0x178   : > { %v615_v37 = vmax.f32 %v555_v23, 0.0  ;;  %v558_v38 = vadd.f32 %v3854_v32, %v5015_v63  ;;  %v549_v39 = vpop.f32.mrb[23].mxu0  ;;  %3887 = vmatprep.mubr.msk.bf16.mxu0 %vm805_vm2, %v5149_v8  ;;  %v5168_v41 = vpack.c.bf16 %v685_v33, %v745_v10  ;;  %v1265_v44 = vsel %vm1236_vm1, %v1263_v2, %v1264_v14 }
 0x179   : > { %v613_v45 = vmax.f32 %v547_v30, 0.0  ;;  %v550_v47 = vadd.f32 %v5015_v63, %v549_v39  ;;  %v5172_v48 = vpack.c.bf16 %v1325_v29, %v1265_v44  ;;  %v5174_v49 = vpack.c.bf16 %v1326_v19, %v1268_v28 }
 0x17a   : > { %v692_v55 = vrot.slane %v615_v37, 7  ;;  %v616_v56 = vmax.f32 %v558_v38, 0.0  ;;  %3991 = vmatprep.mubr.msk.bf16.mxu1 %vm805_vm2, %v5168_v41  ;;  %v5818_v0 = vmov 0.0   ;;  %v1272_v3 = vrot.slane %v615_v37, 1 }
 0x17b   : > { %5836 = vst [vmem:[#allocation12_spill] sm:$0xff] %v5172_v48  ;;  %5837 = vst [vmem:[#allocation13_spill] sm:$0xff] %v5174_v49  ;;  %v5179_v1 = vrot.slane %v5818_v0, 7  ;;  %v689_v6 = vrot.slane %v613_v45, 7  ;;  %v1269_v7 = vrot.slane %v613_v45, 1  ;;  %v614_v2 = vmax.f32 %v550_v47, 0.0  ;;  %3992 = vmatmul.mubr.msk.bf16.gmra.mrb[8].mxu1 %vm805_vm2, %v5163_v61 }
 0x17c   : > { %v748_v9 = vsel %vm656_vm0, 0.0, %v692_v55  ;;  %v693_v10 = vrot.slane %v616_v56, 7  ;;  %v5184_v12 = vpack.c.bf16 %v616_v56, %v615_v37  ;;  %v1273_v14 = vrot.slane %v616_v56, 1 }
 0x17d   : > { %v747_v18 = vsel %vm656_vm0, 0.0, %v689_v6  ;;  %v690_v19 = vrot.slane %v614_v2, 7  ;;  %v5187_v23 = vpack.c.bf16 %v614_v2, %v613_v45  ;;  %v1270_v25 = vrot.slane %v614_v2, 1  ;;  %v3857_v26 = vpop.f32.mrb[24].mxu0 }
 0x17e   : > { %v1328_v28 = vsel %vm1236_vm1, %v1273_v14, 0.0  ;;  %v571_v29 = vadd.f32 %v3857_v26, %v5015_v63  ;;  %v562_v30 = vpop.f32.mrb[25].mxu0  ;;  %v694_v32 = vsel %vm656_vm0, %v692_v55, %v693_v10  ;;  %v1274_v33 = vsel %vm1236_vm1, %v1272_v3, %v1273_v14 }
 0x17f   : > { %v1327_v37 = vsel %vm1236_vm1, %v1270_v25, 0.0  ;;  %v563_v38 = vadd.f32 %v5015_v63, %v562_v30  ;;  %v3858_v39 = vpop.f32.mrb[26].mxu0  ;;  %3888 = vmatmul.mubr.msk.bf16.gmra.mrb[52].mxu0 %vm805_vm2, %v5187_v23  ;;  %v691_v44 = vsel %vm656_vm0, %v689_v6, %v690_v19  ;;  %v5198_v45 = vpack.c.bf16 %v694_v32, %v748_v9 }
 0x180   : > { %v619_v47 = vmax.f32 %v571_v29, 0.0  ;;  %v574_v56 = vadd.f32 %v3858_v39, %v5015_v63  ;;  %v565_v2 = vpop.f32.mrb[27].mxu0  ;;  %3891 = vmatprep.mubr.msk.bf16.mxu0 %vm805_vm2, %v5184_v12  ;;  %v5203_v55 = vpack.c.bf16 %v691_v44, %v747_v18  ;;  %v1271_v3 = vsel %vm1236_vm1, %v1269_v7, %v1270_v25 }
 0x181   : > { %v617_v10 = vmax.f32 %v563_v38, 0.0  ;;  %v566_v14 = vadd.f32 %v5015_v63, %v565_v2  ;;  %v5207_v26 = vpack.c.bf16 %v1327_v37, %v1271_v3  ;;  %v5209_v30 = vpack.c.bf16 %v1328_v28, %v1274_v33 }
 0x182   : > { %v698_v6 = vrot.slane %v619_v47, 7  ;;  %v620_v9 = vmax.f32 %v574_v56, 0.0  ;;  %3995 = vmatprep.mubr.msk.bf16.mxu1 %vm805_vm2, %v5203_v55  ;;  %v736_v19 = vsel %vm656_vm0, 0.0, %v5179_v1  ;;  %v1278_v29 = vrot.slane %v619_v47, 1 }
 0x183   : > { %5838 = vst [vmem:[#allocation14_spill] sm:$0xff] %v5207_v26  ;;  %5839 = vst [vmem:[#allocation15_spill] sm:$0xff] %v5209_v30  ;;  %v695_v18 = vrot.slane %v617_v10, 7  ;;  %v1275_v32 = vrot.slane %v617_v10, 1  ;;  %v618_v39 = vmax.f32 %v566_v14, 0.0  ;;  %3996 = vmatmul.mubr.msk.bf16.gmra.mrb[12].mxu1 %vm805_vm2, %v5198_v45 }
 0x184   : > { %v750_v7 = vsel %vm656_vm0, 0.0, %v698_v6  ;;  %v699_v25 = vrot.slane %v620_v9, 7  ;;  %v5218_v28 = vpack.c.bf16 %v620_v9, %v619_v47  ;;  %v1279_v33 = vrot.slane %v620_v9, 1 }
 0x185   : > { %v749_v37 = vsel %vm656_vm0, 0.0, %v695_v18  ;;  %v696_v38 = vrot.slane %v618_v39, 7  ;;  %v5221_v44 = vpack.c.bf16 %v618_v39, %v617_v10  ;;  %v1276_v56 = vrot.slane %v618_v39, 1  ;;  %v3861_v2 = vpop.f32.mrb[28].mxu0 }
 0x186   : > { %v1330_v3 = vsel %vm1236_vm1, %v1279_v33, 0.0  ;;  %v587_v14 = vadd.f32 %v3861_v2, %v5015_v63  ;;  %v578_v58 = vpop.f32.mrb[29].mxu0  ;;  %v700_v0 = vsel %vm656_vm0, %v698_v6, %v699_v25  ;;  %v1280_v30 = vsel %vm1236_vm1, %v1278_v29, %v1279_v33 }
 0x187   : > { %v1329_v47 = vsel %vm1236_vm1, %v1276_v56, 0.0  ;;  %v579_v9 = vadd.f32 %v5015_v63, %v578_v58  ;;  %v3862_v26 = vpop.f32.mrb[30].mxu0  ;;  %3892 = vmatmul.mubr.msk.bf16.gmra.mrb[56].mxu0 %vm805_vm2, %v5221_v44  ;;  %v697_v10 = vsel %vm656_vm0, %v695_v18, %v696_v38  ;;  %v5232_v39 = vpack.c.bf16 %v700_v0, %v750_v7 }
 0x188   : > { %v623_v49 = vmax.f32 %v587_v14, 0.0  ;;  %v590_v2 = vadd.f32 %v3862_v26, %v5015_v63  ;;  %v581_v48 = vpop.f32.mrb[31].mxu0  ;;  %3895 = vmatprep.mubr.msk.bf16.mxu0 %vm805_vm2, %v5218_v28  ;;  %v5237_v6 = vpack.c.bf16 %v697_v10, %v749_v37  ;;  %v1277_v29 = vsel %vm1236_vm1, %v1275_v32, %v1276_v56 }
 0x189   : > { %v621_v58 = vmax.f32 %v579_v9, 0.0  ;;  %v582_v25 = vadd.f32 %v5015_v63, %v581_v48  ;;  %v5241_v33 = vpack.c.bf16 %v1329_v47, %v1277_v29  ;;  %v5243_v53 = vpack.c.bf16 %v1330_v3, %v1280_v30 }
 0x18a   : > { %v1608_v0 = vrot.slane %v623_v49, 7  ;;  %v624_v18 = vmax.f32 %v590_v2, 0.0  ;;  %3999 = vmatprep.mubr.msk.bf16.mxu1 %vm805_vm2, %v5237_v6  ;;  %v2042_v26 = vrot.slane %v623_v49, 1  ;;  %v5250_v32 = vpack.c.bf16 %v5179_v1, %v736_v19 }
 0x18b   : > { %v701_v7 = vrot.slane %v621_v58, 7  ;;  %v622_v38 = vmax.f32 %v582_v25, 0.0  ;;  %4000 = vmatmul.mubr.msk.bf16.gmra.mrb[16].mxu1 %vm805_vm2, %v5232_v39  ;;  %v1281_v37 = vrot.slane %v621_v58, 1 }
 0x18c   : > { %v1609_v63 = vrot.slane %v624_v18, 7  ;;  %v5252_v48 = vpack.c.bf16 %v624_v18, %v623_v49  ;;  %v2043_v30 = vrot.slane %v624_v18, 1  ;;  %v1613_v56 = vsel %vm656_vm0, 0.0, %v1608_v0 }
 0x18d   : > { %v702_v3 = vrot.slane %v622_v38, 7  ;;  %v5255_v14 = vpack.c.bf16 %v622_v38, %v621_v58  ;;  %v1282_v47 = vrot.slane %v622_v38, 1  ;;  %v751_v9 = vsel %vm656_vm0, 0.0, %v701_v7 }
 0x18e   : > { %v2047_v10 = vsel %vm1236_vm1, %v2043_v30, 0.0  ;;  %v1610_v2 = vsel %vm656_vm0, %v1608_v0, %v1609_v63  ;;  %v2044_v1 = vsel %vm1236_vm1, %v2042_v26, %v2043_v30  ;;  %v4567_v26 = vld [vmem:[#allocation5 + $0x28] sm:$0xff]   ;;  %v4570_v30 = vld [vmem:[#allocation5 + $0x70] sm:$0xff]  }
 0x18f   : > { %v1331_v19 = vsel %vm1236_vm1, %v1282_v47, 0.0  ;;  %3896 = vmatmul.mubr.msk.bf16.gmra.mrb[60].mxu0 %vm805_vm2, %v5255_v14  ;;  %v703_v49 = vsel %vm656_vm0, %v701_v7, %v702_v3  ;;  %v5265_v29 = vpack.c.bf16 %v1610_v2, %v1613_v56  ;;  %v1283_v58 = vsel %vm1236_vm1, %v1281_v37, %v1282_v47  ;;  %v4565_v7 = vld [vmem:[#allocation5 + $0x58] sm:$0xff]   ;;  %v4569_v63 = vld [vmem:[#allocation5 + $0x68] sm:$0xff]   ;;  %v5845_v3 = vld [vmem:[#allocation15_spill] sm:$0xff] }
 0x190   : > { %v5268_v25 = vpack.c.bf16 %v703_v49, %v751_v9  ;;  %3903 = vmatprep.mubr.msk.bf16.mxu0 %vm805_vm2, %v5250_v32  ;;  %v5272_v18 = vpack.c.bf16 %v1331_v19, %v1283_v58  ;;  %v5274_v0 = vpack.c.bf16 %v2047_v10, %v2044_v1  ;;  %v5844_v56 = vld [vmem:[#allocation14_spill] sm:$0xff]  ;;  %v4571_v47 = vld [vmem:[#allocation5 + $0x78] sm:$0xff]   ;;  %v5576_v9 = vld [vmem:[%s5811_s5] ss:$0 sm:$0xff] }
 0x192   : > { %4003 = vmatprep.mubr.msk.bf16.mxu1 %vm805_vm2, %v5268_v25 }
 0x193   : > { %4004 = vmatmul.mubr.msk.bf16.gmra.mrb[20].mxu1 %vm805_vm2, %v5265_v29 }
 0x194   : > { %4011 = vmatprep.mubr.msk.bf16.mxu1 %vm805_vm2, %v5024_v21  ;;  %v4568_v21 = vld [vmem:[#allocation5 + $0x60] sm:$0xff]  }
 0x197   : > { %3904 = vmatmul.mubr.msk.bf16.vlgmr.msra.gmra.mrb[32].mxu0 %vm805_vm2, %v5037_v35 }
 0x198   : > { %3907 = vmatprep.mubr.msk.bf16.mxu0 %vm805_vm2, %v5035_v34  ;;  %3936 = vmatpush3.bf16.msra.mxu0 %v5044_v42  ;;  %v5840_v42 = vmov 0.0  }
 0x199   : > { %3937 = vmatprep.subr.bf16.mxu0 %v4567_v26 }
 0x19b   : > { %4012 = vmatmul.mubr.msk.bf16.vlgmr.msra.gmra.mrb[24].mxu1 %vm805_vm2, %v5021_v17 }
 0x19c   : > { %4044 = vmatpush3.bf16.msra.mxu1 %v5119_v27  ;;  %4015 = vmatprep.mubr.msk.bf16.mxu1 %vm805_vm2, %v5055_v62  ;;  %v1237_v27 = vrot.slane %v5840_v42, 1 }
 0x19d   : > { %4045 = vmatprep.subr.bf16.mxu1 %v4565_v7  ;;  %3938 = vmatpush3.bf16.msra.mxu0 %v4567_v26 }
 0x19e   : > { %3971 = vmatprep.subr.bf16.mxu0 %v5001_v59  ;;  %v1316_v38 = vsel %vm1236_vm1, %v1237_v27, 0.0 }
 0x19f   : > { %3908 = vmatmul.mubr.msk.bf16.gmra.mrb[36].mxu0 %vm805_vm2, %v5072_v15  ;;  %v5343_v37 = vpack.c.bf16 %v1316_v38, %v1237_v27 }
 0x1a0   : > { %3911 = vmatprep.mubr.msk.bf16.mxu0 %vm805_vm2, %v5067_v11  ;;  %4046 = vmatpush3.bf16.msra.mxu1 %v4565_v7 }
 0x1a1   : > { %4079 = vmatprep.subr.bf16.mxu1 %v4568_v21 }
 0x1a3   : > { %4016 = vmatmul.mubr.msk.bf16.gmra.mrb[28].mxu1 %vm805_vm2, %v5052_v54 }
 0x1a4   : > { %4019 = vmatprep.mubr.msk.bf16.mxu1 %vm805_vm2, %v5083_v36 }
 0x1a7   : > { %3912 = vmatmul.mubr.msk.bf16.gmra.mrb[40].mxu0 %vm805_vm2, %v5100_v57 }
 0x1a8   : > { %3915 = vmatprep.mubr.msk.bf16.mxu0 %vm805_vm2, %v5095_v52 }
 0x1ab   : > { %4020 = vmatmul.mubr.msk.bf16.gmra.mrb[0].mxu1 %vm805_vm2, %v5081_v31 }
 0x1ac   : > { %4023 = vmatprep.mubr.msk.bf16.mxu1 %vm805_vm2, %v5117_v24 }
 0x1af   : > { %3916 = vmatmul.mubr.msk.bf16.gmra.mrb[44].mxu0 %vm805_vm2, %v5135_v46 }
 0x1b0   : > { %3919 = vmatprep.mubr.msk.bf16.mxu0 %vm805_vm2, %v5130_v40 }
 0x1b3   : > { %4024 = vmatmul.mubr.msk.bf16.gmra.mrb[4].mxu1 %vm805_vm2, %v5113_v16 }
 0x1b4   : > { %4027 = vmatprep.mubr.msk.bf16.mxu1 %vm805_vm2, %v5152_v13 }
 0x1b7   : > { %3920 = vmatmul.mubr.msk.bf16.gmra.mrb[48].mxu0 %vm805_vm2, %v5168_v41 }
 0x1b8   : > { %3923 = vmatprep.mubr.msk.bf16.mxu0 %vm805_vm2, %v5163_v61 }
 0x1bb   : > { %4028 = vmatmul.mubr.msk.bf16.gmra.mrb[8].mxu1 %vm805_vm2, %v5149_v8 }
 0x1bc   : > { %4031 = vmatprep.mubr.msk.bf16.mxu1 %vm805_vm2, %v5187_v23 }
 0x1bf   : > { %3924 = vmatmul.mubr.msk.bf16.gmra.mrb[52].mxu0 %vm805_vm2, %v5203_v55 }
 0x1c0   : > { %3927 = vmatprep.mubr.msk.bf16.mxu0 %vm805_vm2, %v5198_v45 }
 0x1c3   : > { %4032 = vmatmul.mubr.msk.bf16.gmra.mrb[12].mxu1 %vm805_vm2, %v5184_v12 }
 0x1c4   : > { %4035 = vmatprep.mubr.msk.bf16.mxu1 %vm805_vm2, %v5221_v44 }
 0x1c7   : > { %3928 = vmatmul.mubr.msk.bf16.gmra.mrb[56].mxu0 %vm805_vm2, %v5237_v6 }
 0x1c8   : > { %3931 = vmatprep.mubr.msk.bf16.mxu0 %vm805_vm2, %v5232_v39 }
 0x1cb   : > { %4036 = vmatmul.mubr.msk.bf16.gmra.mrb[16].mxu1 %vm805_vm2, %v5218_v28 }
 0x1cc   : > { %4039 = vmatprep.mubr.msk.bf16.mxu1 %vm805_vm2, %v5255_v14 }
 0x1cf   : > { %3932 = vmatmul.mubr.msk.bf16.gmra.mrb[60].mxu0 %vm805_vm2, %v5268_v25 }
 0x1d0   : > { %3939 = vmatprep.mubr.msk.bf16.mxu0 %vm805_vm2, %v5343_v37 }
 0x1d3   : > { %4040 = vmatmul.mubr.msk.bf16.gmra.mrb[20].mxu1 %vm805_vm2, %v5252_v48 }
 0x1d4   : > { %4047 = vmatprep.mubr.msk.bf16.mxu1 %vm805_vm2, %v5046_v43 }
 0x1d7   : > { %3940 = vmatmul.mubr.msk.bf16.vlgmr.msra.gmra.mrb[32].mxu0 %vm805_vm2, %v5046_v43  ;;  %v5843_v43 = vld [vmem:[#allocation13_spill] sm:$0xff] }
 0x1d8   : > { %3943 = vmatprep.mubr.msk.bf16.mxu0 %vm805_vm2, %v5049_v51  ;;  %3972 = vmatpush3.bf16.msra.mxu0 %v5001_v59  ;;  %v5841_v59 = vld [vmem:[#allocation11_spill] sm:$0xff] }
 0x1d9   : > { %3973 = vmatprep.subr.bf16.mxu0 %v5005_v60 }
 0x1db   : > { %4048 = vmatmul.mubr.msk.bf16.vlgmr.msra.gmra.mrb[24].mxu1 %vm805_vm2, %v5049_v51 }
 0x1dc   : > { %4080 = vmatpush3.bf16.msra.mxu1 %v4568_v21  ;;  %4051 = vmatprep.mubr.msk.bf16.mxu1 %vm805_vm2, %v5076_v20 }
 0x1dd   : > { %4081 = vmatprep.subr.bf16.mxu1 %v4569_v63  ;;  %3974 = vmatpush3.bf16.msra.mxu0 %v5005_v60  ;;  %v5842_v60 = vld [vmem:[#allocation12_spill] sm:$0xff] }
 0x1df   : > { %3944 = vmatmul.mubr.msk.bf16.gmra.mrb[36].mxu0 %vm805_vm2, %v5076_v20 }
 0x1e0   : > { %3947 = vmatprep.mubr.msk.bf16.mxu0 %vm805_vm2, %v5078_v22  ;;  %4082 = vmatpush3.bf16.msra.mxu1 %v4569_v63 }
 0x1e1   : > { %4115 = vmatprep.subr.bf16.mxu1 %v4570_v30 }
 0x1e3   : > { %4052 = vmatmul.mubr.msk.bf16.gmra.mrb[28].mxu1 %vm805_vm2, %v5078_v22 }
 0x1e4   : > { %4055 = vmatprep.mubr.msk.bf16.mxu1 %vm805_vm2, %v5104_v4 }
 0x1e7   : > { %3948 = vmatmul.mubr.msk.bf16.gmra.mrb[40].mxu0 %vm805_vm2, %v5104_v4 }
 0x1e8   : > { %3951 = vmatprep.mubr.msk.bf16.mxu0 %vm805_vm2, %v5106_v5 }
 0x1eb   : > { %4056 = vmatmul.mubr.msk.bf16.gmra.mrb[0].mxu1 %vm805_vm2, %v5106_v5 }
 0x1ec   : > { %4059 = vmatprep.mubr.msk.bf16.mxu1 %vm805_vm2, %v5140_v50 }
 0x1ef   : > { %3952 = vmatmul.mubr.msk.bf16.gmra.mrb[44].mxu0 %vm805_vm2, %v5140_v50 }
 0x1f0   : > { %3955 = vmatprep.mubr.msk.bf16.mxu0 %vm805_vm2, %v5841_v59 }
 0x1f3   : > { %4060 = vmatmul.mubr.msk.bf16.gmra.mrb[4].mxu1 %vm805_vm2, %v5841_v59 }
 0x1f4   : > { %4063 = vmatprep.mubr.msk.bf16.mxu1 %vm805_vm2, %v5842_v60 }
 0x1f7   : > { %3956 = vmatmul.mubr.msk.bf16.gmra.mrb[48].mxu0 %vm805_vm2, %v5842_v60 }
 0x1f8   : > { %3959 = vmatprep.mubr.msk.bf16.mxu0 %vm805_vm2, %v5843_v43 }
 0x1fb   : > { %4064 = vmatmul.mubr.msk.bf16.gmra.mrb[8].mxu1 %vm805_vm2, %v5843_v43 }
 0x1fc   : > { %4067 = vmatprep.mubr.msk.bf16.mxu1 %vm805_vm2, %v5844_v56 }
 0x1ff   : > { %3960 = vmatmul.mubr.msk.bf16.gmra.mrb[52].mxu0 %vm805_vm2, %v5844_v56 }
 0x200   : > { %3963 = vmatprep.mubr.msk.bf16.mxu0 %vm805_vm2, %v5845_v3 }
 0x203   : > { %4068 = vmatmul.mubr.msk.bf16.gmra.mrb[12].mxu1 %vm805_vm2, %v5845_v3 }
 0x204   : > { %4071 = vmatprep.mubr.msk.bf16.mxu1 %vm805_vm2, %v5241_v33 }
 0x207   : > { %3964 = vmatmul.mubr.msk.bf16.gmra.mrb[56].mxu0 %vm805_vm2, %v5241_v33 }
 0x208   : > { %3967 = vmatprep.mubr.msk.bf16.mxu0 %vm805_vm2, %v5243_v53 }
 0x20b   : > { %4072 = vmatmul.mubr.msk.bf16.gmra.mrb[16].mxu1 %vm805_vm2, %v5243_v53 }
 0x20c   : > { %4075 = vmatprep.mubr.msk.bf16.mxu1 %vm805_vm2, %v5272_v18 }
 0x20f   : > { %3968 = vmatmul.mubr.msk.bf16.gmra.mrb[60].mxu0 %vm805_vm2, %v5272_v18 }
 0x210   : > { %3975 = vmatprep.mubr.msk.bf16.mxu0 %vm805_vm2, %v5037_v35  ;;  %v4572_v35 = vld [vmem:[#allocation5 + $0x80] sm:$0xff]  }
 0x213   : > { %4076 = vmatmul.mubr.msk.bf16.gmra.mrb[20].mxu1 %vm805_vm2, %v5274_v0 }
 0x214   : > { %4083 = vmatprep.mubr.msk.bf16.mxu1 %vm805_vm2, %v5035_v34 }
 0x217   : > { %3976 = vmatmul.mubr.msk.bf16.vlgmr.msra.gmra.mrb[32].mxu0 %vm805_vm2, %v5035_v34  ;;  %v4573_v34 = vld [vmem:[#allocation5 + $0x88] sm:$0xff]  }
 0x218   : > { %3979 = vmatprep.mubr.msk.bf16.mxu0 %vm805_vm2, %v5072_v15 }
 0x21b   : > { %4084 = vmatmul.mubr.msk.bf16.vlgmr.msra.gmra.mrb[24].mxu1 %vm805_vm2, %v5072_v15 }
 0x21c   : > { %4116 = vmatpush3.bf16.msra.mxu1 %v4570_v30  ;;  %4087 = vmatprep.mubr.msk.bf16.mxu1 %vm805_vm2, %v5067_v11 }
 0x21d   : > { %4117 = vmatprep.subr.bf16.mxu1 %v4571_v47 }
 0x21f   : > { %3980 = vmatmul.mubr.msk.bf16.gmra.mrb[36].mxu0 %vm805_vm2, %v5067_v11 }
 0x220   : > { %4118 = vmatpush3.bf16.msra.mxu1 %v4571_v47 }
 0x221   : > { %4151 = vmatprep.subr.bf16.mxu1 %v4572_v35 }
 0x223   : > { %4088 = vmatmul.mubr.msk.bf16.gmra.mrb[28].mxu1 %vm805_vm2, %v5100_v57 }
 0x224   : > { %4091 = vmatprep.mubr.msk.bf16.mxu1 %vm805_vm2, %v5095_v52 }
 0x22b   : > { %4092 = vmatmul.mubr.msk.bf16.gmra.mrb[0].mxu1 %vm805_vm2, %v5135_v46 }
 0x22c   : > { %4095 = vmatprep.mubr.msk.bf16.mxu1 %vm805_vm2, %v5130_v40 }
 0x233   : > { %4096 = vmatmul.mubr.msk.bf16.gmra.mrb[4].mxu1 %vm805_vm2, %v5168_v41 }
 0x234   : > { %4099 = vmatprep.mubr.msk.bf16.mxu1 %vm805_vm2, %v5163_v61 }
 0x23b   : > { %4100 = vmatmul.mubr.msk.bf16.gmra.mrb[8].mxu1 %vm805_vm2, %v5203_v55 }
 0x23c   : > { %4103 = vmatprep.mubr.msk.bf16.mxu1 %vm805_vm2, %v5198_v45 }
 0x243   : > { %4104 = vmatmul.mubr.msk.bf16.gmra.mrb[12].mxu1 %vm805_vm2, %v5237_v6 }
 0x244   : > { %4107 = vmatprep.mubr.msk.bf16.mxu1 %vm805_vm2, %v5232_v39 }
 0x24b   : > { %4108 = vmatmul.mubr.msk.bf16.gmra.mrb[16].mxu1 %vm805_vm2, %v5268_v25 }
 0x24c   : > { %4111 = vmatprep.mubr.msk.bf16.mxu1 %vm805_vm2, %v5265_v29 }
 0x253   : > { %4112 = vmatmul.mubr.msk.bf16.gmra.mrb[20].mxu1 %vm805_vm2, %v5250_v32 }
 0x254   : > { %4119 = vmatprep.mubr.msk.bf16.mxu1 %vm805_vm2, %v5021_v17  ;;  %v4574_v17 = vld [vmem:[%s5809_s3] sm:$0xff]  }
 0x255   : > { %4187 = vmatprep.subr.bf16.mxu0 %v4574_v17 }
 0x256   : > { %4188 = vmatpush3.bf16.msra.mxu0 %v4574_v17 }
 0x25b   : > { %4120 = vmatmul.mubr.msk.bf16.vlgmr.msra.gmra.mrb[24].mxu1 %vm805_vm2, %v5055_v62 }
 0x25c   : > { %4152 = vmatpush3.bf16.msra.mxu1 %v4572_v35  ;;  %4123 = vmatprep.mubr.msk.bf16.mxu1 %vm805_vm2, %v5052_v54  ;;  %v5846_v54 = vmov 0.0|0.0  }
 0x25d   : > { %4153 = vmatprep.subr.bf16.mxu1 %v4573_v34 }
 0x260   : > { %4154 = vmatpush3.bf16.msra.mxu1 %v4573_v34 }
 0x263   : > { %4124 = vmatmul.mubr.msk.bf16.gmra.mrb[28].mxu1 %vm805_vm2, %v5083_v36 }
 0x264   : > { %4127 = vmatprep.mubr.msk.bf16.mxu1 %vm805_vm2, %v5081_v31 }
 0x26b   : > { %4128 = vmatmul.mubr.msk.bf16.gmra.mrb[0].mxu1 %vm805_vm2, %v5117_v24 }
 0x26c   : > { %4131 = vmatprep.mubr.msk.bf16.mxu1 %vm805_vm2, %v5113_v16 }
 0x273   : > { %4132 = vmatmul.mubr.msk.bf16.gmra.mrb[4].mxu1 %vm805_vm2, %v5152_v13 }
 0x274   : > { %4135 = vmatprep.mubr.msk.bf16.mxu1 %vm805_vm2, %v5149_v8 }
 0x27b   : > { %4136 = vmatmul.mubr.msk.bf16.gmra.mrb[8].mxu1 %vm805_vm2, %v5187_v23 }
 0x27c   : > { %4139 = vmatprep.mubr.msk.bf16.mxu1 %vm805_vm2, %v5184_v12 }
 0x283   : > { %4140 = vmatmul.mubr.msk.bf16.gmra.mrb[12].mxu1 %vm805_vm2, %v5221_v44 }
 0x284   : > { %4143 = vmatprep.mubr.msk.bf16.mxu1 %vm805_vm2, %v5218_v28 }
 0x28b   : > { %4144 = vmatmul.mubr.msk.bf16.gmra.mrb[16].mxu1 %vm805_vm2, %v5255_v14 }
 0x28c   : > { %4147 = vmatprep.mubr.msk.bf16.mxu1 %vm805_vm2, %v5252_v48  ;;  %v4575_v48 = vld [vmem:[%s5809_s3 + $0x8] sm:$0xff]  }
 0x28d   : > { %4189 = vmatprep.subr.bf16.mxu0 %v4575_v48 }
 0x28e   : > { %4190 = vmatpush3.bf16.msra.mxu0 %v4575_v48 }
 0x293   : > { %4148 = vmatmul.mubr.bf16.gmra.mrb[20].mxu1 %v5846_v54 }
 0x294   : > { %4155 = vmatprep.mubr.msk.bf16.mxu1 %vm805_vm2, %v5049_v51 }
 0x29b   : > { %4156 = vmatmul.mubr.msk.bf16.vlgmr.msra.gmra.mrb[24].mxu1 %vm805_vm2, %v5076_v20 }
 0x29c   : > { %4159 = vmatprep.mubr.msk.bf16.mxu1 %vm805_vm2, %v5078_v22 }
 0x2a3   : > { %4160 = vmatmul.mubr.msk.bf16.gmra.mrb[28].mxu1 %vm805_vm2, %v5104_v4 }
 0x2a4   : > { %4163 = vmatprep.mubr.msk.bf16.mxu1 %vm805_vm2, %v5106_v5 }
 0x2ab   : > { %4164 = vmatmul.mubr.msk.bf16.gmra.mrb[0].mxu1 %vm805_vm2, %v5140_v50 }
 0x2ac   : > { %4167 = vmatprep.mubr.msk.bf16.mxu1 %vm805_vm2, %v5841_v59 }
 0x2b3   : > { %4168 = vmatmul.mubr.msk.bf16.gmra.mrb[4].mxu1 %vm805_vm2, %v5842_v60 }
 0x2b4   : > { %4171 = vmatprep.mubr.msk.bf16.mxu1 %vm805_vm2, %v5843_v43 }
 0x2ba   : > { %v5508_v51 = vpop.f32.mrb[40].mxu0 }
 0x2bb   : > { %v5510_v62 = vpop.f32.mrb[41].mxu0  ;;  %4172 = vmatmul.mubr.msk.bf16.gmra.mrb[8].mxu1 %vm805_vm2, %v5844_v56 }
 0x2bc   : > { %v5514_v11 = vpop.f32.mrb[42].mxu0  ;;  %4175 = vmatprep.mubr.msk.bf16.mxu1 %vm805_vm2, %v5845_v3 }
 0x2bd   : > { %v5518_v15 = vpop.f32.mrb[43].mxu0 }
 0x2c2   : > { %v5520_v20 = vpop.f32.mrb[44].mxu0 }
 0x2c3   : > { %v5522_v22 = vpop.f32.mrb[45].mxu0  ;;  %4176 = vmatmul.mubr.msk.bf16.gmra.mrb[12].mxu1 %vm805_vm2, %v5241_v33 }
 0x2c4   : > { %v5526_v31 = vpop.f32.mrb[46].mxu0  ;;  %4179 = vmatprep.mubr.msk.bf16.mxu1 %vm805_vm2, %v5243_v53 }
 0x2c5   : > { %v5530_v36 = vpop.f32.mrb[47].mxu0 }
 0x2ca   : > { %v5532_v52 = vpop.f32.mrb[48].mxu0 }
 0x2cb   : > { %v5534_v57 = vpop.f32.mrb[49].mxu0  ;;  %4180 = vmatmul.mubr.msk.bf16.gmra.mrb[16].mxu1 %vm805_vm2, %v5272_v18 }
 0x2cc   : > { %v5538_v4 = vpop.f32.mrb[50].mxu0  ;;  %4183 = vmatprep.mubr.msk.bf16.mxu1 %vm805_vm2, %v5274_v0 }
 0x2cd   : > { %v5542_v5 = vpop.f32.mrb[51].mxu0 }
 0x2d2   : > { %v5544_v16 = vpop.f32.mrb[52].mxu0 }
 0x2d3   : > { %v5546_v24 = vpop.f32.mrb[53].mxu0  ;;  %4184 = vmatmul.mubr.msk.bf16.gmra.mrb[20].mxu1 %vm805_vm2, %v5343_v37 }
 0x2d4   : > { %v5550_v40 = vpop.f32.mrb[54].mxu0 }
 0x2d5   : > { %v5552_v46 = vpop.f32.mrb[55].mxu0 }
 0x2da   : > { %v5554_v50 = vpop.f32.mrb[56].mxu0 }
 0x2db   : > { %v5556_v53 = vpop.f32.mrb[57].mxu0 }
 0x2dc   : > { %v5558_v8 = vpop.f32.mrb[58].mxu0 }
 0x2dd   : > { %v5560_v13 = vpop.f32.mrb[59].mxu0 }
 0x2e2   : > { %v5562_v61 = vpop.f32.mrb[60].mxu0 }
 0x2e3   : > { %v5564_v41 = vpop.f32.mrb[61].mxu0 }
 0x2e4   : > { %v5566_v12 = vpop.f32.mrb[62].mxu0 }
 0x2e5   : > { %v5568_v23 = vpop.f32.mrb[63].mxu0 }
 0x2ea   : > { %v3977_v45 = vpop.f32.mrb[32].mxu0 }
 0x2eb   : > { %v1669_v55 = vpop.f32.mrb[33].mxu0 }
 0x2ec   : > { %v3978_v28 = vpop.f32.mrb[34].mxu0 }
 0x2ed   : > { %v1672_v44 = vpop.f32.mrb[35].mxu0 }
 0x2f2   : > { %v3981_v39 = vpop.f32.mrb[36].mxu0 }
 0x2f3   : > { %v1685_v6 = vpop.f32.mrb[37].mxu0 }
 0x2f4   : > { %v3982_v33 = vpop.f32.mrb[38].mxu0 }
 0x2f5   : > { %v1688_v32 = vpop.f32.mrb[39].mxu0 }
 0x36e   : > { %v4157_v14 = vpop.f32.mrb[24].mxu1 }
 0x36f   : > { %v4227_v10 = vadd.f32 %v4157_v14, %v3977_v45  ;;  %v2733_v2 = vpop.f32.mrb[25].mxu1 }
 0x370   : > { %v4228_v1 = vadd.f32 %v2733_v2, %v1669_v55  ;;  %v4158_v19 = vpop.f32.mrb[26].mxu1 }
 0x371   : > { %v2901_v49 = vadd.f32 %v4227_v10, %v5576_v9  ;;  %v4229_v29 = vadd.f32 %v4158_v19, %v3978_v28  ;;  %v2736_v58 = vpop.f32.mrb[27].mxu1 }
 0x372   : > { %v2899_v25 = vadd.f32 %v4228_v1, %v5576_v9  ;;  %v4230_v18 = vadd.f32 %v2736_v58, %v1672_v44 }
 0x373   : > { %v2902_v0 = vadd.f32 %v4229_v29, %v5576_v9  ;;  %v2933_v7 = vmax.f32 %v2901_v49, 0.0 }
 0x374   : > { %v2900_v26 = vadd.f32 %v4230_v18, %v5576_v9  ;;  %v2931_v42 = vmax.f32 %v2899_v25, 0.0 }
 0x375   : > { %v2934_v21 = vmax.f32 %v2902_v0, 0.0 }
 0x376   : > { %v2932_v27 = vmax.f32 %v2900_v26, 0.0  ;;  %v4161_v38 = vpop.f32.mrb[28].mxu1 }
 0x377   : > { %v2964_v37 = vpack.c.bf16 %v2934_v21, %v2933_v7  ;;  %v4231_v63 = vadd.f32 %v4161_v38, %v3981_v39  ;;  %v2749_v30 = vpop.f32.mrb[29].mxu1 }
 0x378   : > { %v2963_v59 = vpack.c.bf16 %v2932_v27, %v2931_v42  ;;  %v4232_v60 = vadd.f32 %v2749_v30, %v1685_v6  ;;  %v4162_v43 = vpop.f32.mrb[30].mxu1 }
 0x379   : > { %v2905_v56 = vadd.f32 %v4231_v63, %v5576_v9  ;;  %v4233_v3 = vadd.f32 %v4162_v43, %v3982_v33  ;;  %v2752_v47 = vpop.f32.mrb[31].mxu1 }
 0x37a   : > { %v2903_v35 = vadd.f32 %v4232_v60, %v5576_v9  ;;  %v4234_v34 = vadd.f32 %v2752_v47, %v1688_v32  ;;  %4191 = vmatprep.mubr.msk.bf16.mxu0 %vm805_vm2, %v2963_v59 }
 0x37b   : > { %v2906_v17 = vadd.f32 %v4233_v3, %v5576_v9  ;;  %4192 = vmatmul.mubr.msk.bf16.vlgmr.msra.gmra.mrb[64].mxu0 %vm805_vm2, %v2964_v37  ;;  %v2937_v45 = vmax.f32 %v2905_v56, 0.0 }
 0x37c   : > { %v2904_v54 = vadd.f32 %v4234_v34, %v5576_v9  ;;  %v2935_v28 = vmax.f32 %v2903_v35, 0.0 }
 0x37d   : > { %v2938_v55 = vmax.f32 %v2906_v17, 0.0 }
 0x37e   : > { %v2936_v44 = vmax.f32 %v2904_v54, 0.0  ;;  %v4165_v39 = vpop.f32.mrb[0].mxu1 }
 0x37f   : > { %v2966_v6 = vpack.c.bf16 %v2938_v55, %v2937_v45  ;;  %v4235_v33 = vadd.f32 %v4165_v39, %v5508_v51  ;;  %v2765_v48 = vpop.f32.mrb[1].mxu1 }
 0x380   : > { %v2965_v14 = vpack.c.bf16 %v2936_v44, %v2935_v28  ;;  %v4236_v32 = vadd.f32 %v2765_v48, %v5510_v62  ;;  %v4166_v10 = vpop.f32.mrb[2].mxu1 }
 0x381   : > { %v2909_v2 = vadd.f32 %v4235_v33, %v5576_v9  ;;  %v4237_v1 = vadd.f32 %v4166_v10, %v5514_v11  ;;  %v2768_v19 = vpop.f32.mrb[3].mxu1 }
 0x382   : > { %v2907_v49 = vadd.f32 %v4236_v32, %v5576_v9  ;;  %v4238_v29 = vadd.f32 %v2768_v19, %v5518_v15  ;;  %4195 = vmatprep.mubr.msk.bf16.mxu0 %vm805_vm2, %v2965_v14 }
 0x383   : > { %v2910_v58 = vadd.f32 %v4237_v1, %v5576_v9  ;;  %4196 = vmatmul.mubr.msk.bf16.gmra.mrb[68].mxu0 %vm805_vm2, %v2966_v6  ;;  %v2941_v25 = vmax.f32 %v2909_v2, 0.0 }
 0x384   : > { %v2908_v51 = vadd.f32 %v4238_v29, %v5576_v9  ;;  %v2939_v18 = vmax.f32 %v2907_v49, 0.0 }
 0x385   : > { %v2942_v62 = vmax.f32 %v2910_v58, 0.0 }
 0x386   : > { %v2940_v0 = vmax.f32 %v2908_v51, 0.0  ;;  %v4169_v26 = vpop.f32.mrb[4].mxu1 }
 0x387   : > { %v2968_v7 = vpack.c.bf16 %v2942_v62, %v2941_v25  ;;  %v4239_v11 = vadd.f32 %v4169_v26, %v5520_v20  ;;  %v2781_v21 = vpop.f32.mrb[5].mxu1 }
 0x388   : > { %v2967_v42 = vpack.c.bf16 %v2940_v0, %v2939_v18  ;;  %v4240_v15 = vadd.f32 %v2781_v21, %v5522_v22  ;;  %v4170_v27 = vpop.f32.mrb[6].mxu1 }
 0x389   : > { %v2913_v38 = vadd.f32 %v4239_v11, %v5576_v9  ;;  %v4241_v37 = vadd.f32 %v4170_v27, %v5526_v31  ;;  %v2784_v63 = vpop.f32.mrb[7].mxu1 }
 0x38a   : > { %v2911_v30 = vadd.f32 %v4240_v15, %v5576_v9  ;;  %v4242_v59 = vadd.f32 %v2784_v63, %v5530_v36  ;;  %4199 = vmatprep.mubr.msk.bf16.mxu0 %vm805_vm2, %v2967_v42 }
 0x38b   : > { %v2914_v60 = vadd.f32 %v4241_v37, %v5576_v9  ;;  %4200 = vmatmul.mubr.msk.bf16.gmra.mrb[72].mxu0 %vm805_vm2, %v2968_v7  ;;  %v2945_v43 = vmax.f32 %v2913_v38, 0.0 }
 0x38c   : > { %v2912_v20 = vadd.f32 %v4242_v59, %v5576_v9  ;;  %v2943_v56 = vmax.f32 %v2911_v30, 0.0 }
 0x38d   : > { %v2946_v22 = vmax.f32 %v2914_v60, 0.0 }
 0x38e   : > { %v2944_v3 = vmax.f32 %v2912_v20, 0.0  ;;  %v4173_v47 = vpop.f32.mrb[8].mxu1 }
 0x38f   : > { %v2970_v35 = vpack.c.bf16 %v2946_v22, %v2945_v43  ;;  %v4243_v31 = vadd.f32 %v4173_v47, %v5532_v52  ;;  %v2797_v34 = vpop.f32.mrb[9].mxu1 }
 0x390   : > { %v2969_v17 = vpack.c.bf16 %v2944_v3, %v2943_v56  ;;  %v4244_v36 = vadd.f32 %v2797_v34, %v5534_v57  ;;  %v4174_v54 = vpop.f32.mrb[10].mxu1 }
 0x391   : > { %v2917_v45 = vadd.f32 %v4243_v31, %v5576_v9  ;;  %v4245_v55 = vadd.f32 %v4174_v54, %v5538_v4  ;;  %v2800_v28 = vpop.f32.mrb[11].mxu1 }
 0x392   : > { %v2915_v44 = vadd.f32 %v4244_v36, %v5576_v9  ;;  %v4246_v39 = vadd.f32 %v2800_v28, %v5542_v5  ;;  %4203 = vmatprep.mubr.msk.bf16.mxu0 %vm805_vm2, %v2969_v17 }
 0x393   : > { %v2918_v6 = vadd.f32 %v4245_v55, %v5576_v9  ;;  %4204 = vmatmul.mubr.msk.bf16.gmra.mrb[76].mxu0 %vm805_vm2, %v2970_v35  ;;  %v2949_v33 = vmax.f32 %v2917_v45, 0.0 }
 0x394   : > { %v2916_v52 = vadd.f32 %v4246_v39, %v5576_v9  ;;  %v2947_v48 = vmax.f32 %v2915_v44, 0.0 }
 0x395   : > { %v2950_v57 = vmax.f32 %v2918_v6, 0.0 }
 0x396   : > { %v2948_v14 = vmax.f32 %v2916_v52, 0.0  ;;  %v4177_v32 = vpop.f32.mrb[12].mxu1 }
 0x397   : > { %v2972_v10 = vpack.c.bf16 %v2950_v57, %v2949_v33  ;;  %v4247_v4 = vadd.f32 %v4177_v32, %v5544_v16  ;;  %v2813_v2 = vpop.f32.mrb[13].mxu1 }
 0x398   : > { %v2971_v1 = vpack.c.bf16 %v2948_v14, %v2947_v48  ;;  %v4248_v5 = vadd.f32 %v2813_v2, %v5546_v24  ;;  %v4178_v19 = vpop.f32.mrb[14].mxu1  ;;  %v4576_v48 = vld [vmem:[%s4934_s11 + $0x10] sm:$0xff] }
 0x399   : > { %v2921_v49 = vadd.f32 %v4247_v4, %v5576_v9  ;;  %v4249_v29 = vadd.f32 %v4178_v19, %v5550_v40  ;;  %v2816_v58 = vpop.f32.mrb[15].mxu1  ;;  %v4577_v4 = vld [vmem:[%s4934_s11] sm:$0xff]  ;;  %v4578_v19 = vld [vmem:[%s4934_s11 + $0x18] sm:$0xff] }
 0x39a   : > { %v2919_v51 = vadd.f32 %v4248_v5, %v5576_v9  ;;  %v4250_v25 = vadd.f32 %v2816_v58, %v5552_v46  ;;  %4207 = vmatprep.mubr.msk.bf16.mxu0 %vm805_vm2, %v2971_v1  ;;  %v4579_v58 = vld [vmem:[%s4934_s11 + $0x8] sm:$0xff] }
 0x39b   : > { %v2922_v62 = vadd.f32 %v4249_v29, %v5576_v9  ;;  %4208 = vmatmul.mubr.msk.bf16.gmra.mrb[80].mxu0 %vm805_vm2, %v2972_v10  ;;  %v2953_v18 = vmax.f32 %v2921_v49, 0.0 }
 0x39c   : > { %v2920_v16 = vadd.f32 %v4250_v25, %v5576_v9  ;;  %v2951_v0 = vmax.f32 %v2919_v51, 0.0 }
 0x39d   : > { %v2954_v24 = vmax.f32 %v2922_v62, 0.0 }
 0x39e   : > { %v2952_v26 = vmax.f32 %v2920_v16, 0.0  ;;  %v4181_v7 = vpop.f32.mrb[16].mxu1 }
 0x39f   : > { %v2974_v11 = vpack.c.bf16 %v2954_v24, %v2953_v18  ;;  %v4251_v40 = vadd.f32 %v4181_v7, %v5554_v50  ;;  %v2829_v21 = vpop.f32.mrb[17].mxu1  ;;  %v4580_v7 = vld [vmem:[%s4934_s11 + $0x30] sm:$0xff] }
 0x3a0   : > { %v2973_v42 = vpack.c.bf16 %v2952_v26, %v2951_v0  ;;  %v4252_v46 = vadd.f32 %v2829_v21, %v5556_v53  ;;  %v4182_v15 = vpop.f32.mrb[18].mxu1 }
 0x3a1   : > { %v2925_v27 = vadd.f32 %v4251_v40, %v5576_v9  ;;  %v4253_v38 = vadd.f32 %v4182_v15, %v5558_v8  ;;  %v2832_v37 = vpop.f32.mrb[19].mxu1 }
 0x3a2   : > { %v2923_v63 = vadd.f32 %v4252_v46, %v5576_v9  ;;  %v4254_v30 = vadd.f32 %v2832_v37, %v5560_v13  ;;  %4211 = vmatprep.mubr.msk.bf16.mxu0 %vm805_vm2, %v2973_v42  ;;  %v4581_v42 = vld [vmem:[%s4934_s11 + $0x20] sm:$0xff] }
 0x3a3   : > { %v2926_v59 = vadd.f32 %v4253_v38, %v5576_v9  ;;  %4212 = vmatmul.mubr.msk.bf16.gmra.mrb[84].mxu0 %vm805_vm2, %v2974_v11  ;;  %v2957_v60 = vmax.f32 %v2925_v27, 0.0  ;;  %v4582_v38 = vld [vmem:[%s4934_s11 + $0x38] sm:$0xff] }
 0x3a4   : > { %v2924_v50 = vadd.f32 %v4254_v30, %v5576_v9  ;;  %v2955_v20 = vmax.f32 %v2923_v63, 0.0  ;;  %v4583_v30 = vld [vmem:[%s4934_s11 + $0x28] sm:$0xff] }
 0x3a5   : > { %v2958_v53 = vmax.f32 %v2926_v59, 0.0 }
 0x3a6   : > { %v2956_v43 = vmax.f32 %v2924_v50, 0.0  ;;  %v4185_v22 = vpop.f32.mrb[20].mxu1 }
 0x3a7   : > { %v2976_v56 = vpack.c.bf16 %v2958_v53, %v2957_v60  ;;  %v4255_v8 = vadd.f32 %v4185_v22, %v5562_v61  ;;  %v2845_v3 = vpop.f32.mrb[21].mxu1 }
 0x3a8   : > { %v2975_v47 = vpack.c.bf16 %v2956_v43, %v2955_v20  ;;  %v4256_v13 = vadd.f32 %v2845_v3, %v5564_v41  ;;  %v4186_v35 = vpop.f32.mrb[22].mxu1 }
 0x3a9   : > { %v2929_v31 = vadd.f32 %v4255_v8, %v5576_v9  ;;  %v4257_v34 = vadd.f32 %v4186_v35, %v5566_v12  ;;  %v2848_v17 = vpop.f32.mrb[23].mxu1  ;;  %v4584_v8 = vld [vmem:[%s4934_s11 + $0x50] sm:$0xff]  ;;  %v4585_v35 = vld [vmem:[%s4934_s11 + $0x40] sm:$0xff] }
 0x3aa   : > { %v2927_v36 = vadd.f32 %v4256_v13, %v5576_v9  ;;  %v4258_v54 = vadd.f32 %v2848_v17, %v5568_v23  ;;  %4215 = vmatprep.mubr.msk.bf16.mxu0 %vm805_vm2, %v2975_v47  ;;  %v5653_v23 = vld [vmem:[%s5812_s6] ss:$0 sm:$0xff] }
 0x3ab   : > { %v2930_v45 = vadd.f32 %v4257_v34, %v5576_v9  ;;  %4216 = vmatmul.mubr.msk.bf16.gmra.mrb[88].mxu0 %vm805_vm2, %v2976_v56  ;;  %v2961_v41 = vmax.f32 %v2929_v31, 0.0 }
 0x3ac   : > { %v2928_v61 = vadd.f32 %v4258_v54, %v5576_v9  ;;  %v2959_v28 = vmax.f32 %v2927_v36, 0.0  ;;  %v4586_v36 = vld [vmem:[%s4934_s11 + $0x58] sm:$0xff] }
 0x3ad   : > { %v2962_v55 = vmax.f32 %v2930_v45, 0.0 }
 0x3ae   : > { %v2960_v44 = vmax.f32 %v2928_v61, 0.0  ;;  %v4587_v61 = vld [vmem:[%s4934_s11 + $0x48] sm:$0xff] }
 0x3af   : > { %v2978_v12 = vpack.c.bf16 %v2962_v55, %v2961_v41 }
 0x3b0   : > { %v2977_v39 = vpack.c.bf16 %v2960_v44, %v2959_v28 }
 0x3b2   : > { %4219 = vmatprep.mubr.msk.bf16.mxu0 %vm805_vm2, %v2977_v39 }
 0x3b3   : > { %4220 = vmatmul.mubr.msk.bf16.gmra.mrb[92].mxu0 %vm805_vm2, %v2978_v12 }
 0x44e   : > { %v4193_v6 = vpop.f32.mrb[64].mxu0 }
 0x44f   : > { %v3093_v9 = vadd.f32 %v4193_v6, %v5653_v23  ;;  %v3084_v52 = vpop.f32.mrb[65].mxu0 }
 0x450   : > { %v3085_v33 = vadd.f32 %v5653_v23, %v3084_v52  ;;  %v4194_v57 = vpop.f32.mrb[66].mxu0  ;;  %v4588_v52 = vld [vmem:[%s4934_s11 + $0x70] sm:$0xff] }
 0x451   : > { %v3213_v14 = vadd.f32 %v4576_v48, %v3093_v9  ;;  %v3096_v32 = vadd.f32 %v4194_v57, %v5653_v23  ;;  %v3087_v10 = vpop.f32.mrb[67].mxu0 }
 0x452   : > { %v3211_v2 = vadd.f32 %v4577_v4, %v3085_v33  ;;  %v3088_v1 = vadd.f32 %v5653_v23, %v3087_v10 }
 0x453   : > { %v3245_v5 = vmax.f32 %v3213_v14, 0.0  ;;  %v3214_v49 = vadd.f32 %v4578_v19, %v3096_v32  ;;  %v4589_v14 = vld [vmem:[%s4934_s11 + $0x60] sm:$0xff]  ;;  %v4591_v19 = vld [vmem:[%s4934_s11 + $0x68] sm:$0xff] }
 0x454   : > { %v3243_v29 = vmax.f32 %v3211_v2, 0.0  ;;  %v3212_v51 = vadd.f32 %v4579_v58, %v3088_v1  ;;  %v4590_v2 = vld [vmem:[%s4934_s11 + $0x78] sm:$0xff] }
 0x455   : > { %3277 = vst [vmem:[%s5665_s30 + $0x10] sm:$0xff] %v3245_v5  ;;  %v3246_v25 = vmax.f32 %v3214_v49, 0.0 }
 0x456   : > { %3275 = vst [vmem:[%s5665_s30] sm:$0xff] %v3243_v29  ;;  %v3244_v62 = vmax.f32 %v3212_v51, 0.0  ;;  %v4197_v16 = vpop.f32.mrb[68].mxu0 }
 0x457   : > { %3278 = vst [vmem:[%s5665_s30 + $0x18] sm:$0xff] %v3246_v25  ;;  %v3109_v18 = vadd.f32 %v4197_v16, %v5653_v23  ;;  %v3100_v24 = vpop.f32.mrb[69].mxu0 }
 0x458   : > { %3276 = vst [vmem:[%s5665_s30 + $0x8] sm:$0xff] %v3244_v62  ;;  %v3101_v0 = vadd.f32 %v5653_v23, %v3100_v24  ;;  %v4198_v26 = vpop.f32.mrb[70].mxu0  ;;  %v4592_v24 = vld [vmem:[%s4934_s11 + $0x90] sm:$0xff] }
 0x459   : > { %v3217_v11 = vadd.f32 %v4580_v7, %v3109_v18  ;;  %v3112_v40 = vadd.f32 %v4198_v26, %v5653_v23  ;;  %v3103_v21 = vpop.f32.mrb[71].mxu0 }
 0x45a   : > { %v3215_v46 = vadd.f32 %v4581_v42, %v3101_v0  ;;  %v3104_v15 = vadd.f32 %v5653_v23, %v3103_v21 }
 0x45b   : > { %v3249_v27 = vmax.f32 %v3217_v11, 0.0  ;;  %v3218_v37 = vadd.f32 %v4582_v38, %v3112_v40  ;;  %v4593_v11 = vld [vmem:[%s4934_s11 + $0x80] sm:$0xff]  ;;  %v4595_v38 = vld [vmem:[%s4934_s11 + $0x88] sm:$0xff] }
 0x45c   : > { %v3247_v63 = vmax.f32 %v3215_v46, 0.0  ;;  %v3216_v59 = vadd.f32 %v4583_v30, %v3104_v15  ;;  %v4594_v46 = vld [vmem:[%s4934_s11 + $0x98] sm:$0xff] }
 0x45d   : > { %3281 = vst [vmem:[%s5665_s30 + $0x30] sm:$0xff] %v3249_v27  ;;  %v3250_v50 = vmax.f32 %v3218_v37, 0.0 }
 0x45e   : > { %3279 = vst [vmem:[%s5665_s30 + $0x20] sm:$0xff] %v3247_v63  ;;  %v3248_v60 = vmax.f32 %v3216_v59, 0.0  ;;  %v4201_v53 = vpop.f32.mrb[72].mxu0 }
 0x45f   : > { %3282 = vst [vmem:[%s5665_s30 + $0x38] sm:$0xff] %v3250_v50  ;;  %v3125_v20 = vadd.f32 %v4201_v53, %v5653_v23  ;;  %v3116_v43 = vpop.f32.mrb[73].mxu0 }
 0x460   : > { %3280 = vst [vmem:[%s5665_s30 + $0x28] sm:$0xff] %v3248_v60  ;;  %v3117_v22 = vadd.f32 %v5653_v23, %v3116_v43  ;;  %v4202_v56 = vpop.f32.mrb[74].mxu0  ;;  %v4596_v43 = vld [vmem:[%s4934_s11 + $0xb0] sm:$0xff] }
 0x461   : > { %v3221_v3 = vadd.f32 %v4584_v8, %v3125_v20  ;;  %v3128_v47 = vadd.f32 %v4202_v56, %v5653_v23  ;;  %v3119_v13 = vpop.f32.mrb[75].mxu0 }
 0x462   : > { %v3219_v31 = vadd.f32 %v4585_v35, %v3117_v22  ;;  %v3120_v34 = vadd.f32 %v5653_v23, %v3119_v13 }
 0x463   : > { %v3253_v17 = vmax.f32 %v3221_v3, 0.0  ;;  %v3222_v54 = vadd.f32 %v4586_v36, %v3128_v47  ;;  %v4597_v3 = vld [vmem:[%s4934_s11 + $0xa0] sm:$0xff]  ;;  %v4599_v36 = vld [vmem:[%s4934_s11 + $0xa8] sm:$0xff] }
 0x464   : > { %v3251_v45 = vmax.f32 %v3219_v31, 0.0  ;;  %v3220_v41 = vadd.f32 %v4587_v61, %v3120_v34  ;;  %v4598_v31 = vld [vmem:[%s4934_s11 + $0xb8] sm:$0xff] }
 0x465   : > { %3285 = vst [vmem:[%s5665_s30 + $0x50] sm:$0xff] %v3253_v17  ;;  %v3254_v55 = vmax.f32 %v3222_v54, 0.0 }
 0x466   : > { %3283 = vst [vmem:[%s5665_s30 + $0x40] sm:$0xff] %v3251_v45  ;;  %v3252_v28 = vmax.f32 %v3220_v41, 0.0  ;;  %v4205_v44 = vpop.f32.mrb[76].mxu0 }
 0x467   : > { %3286 = vst [vmem:[%s5665_s30 + $0x58] sm:$0xff] %v3254_v55  ;;  %v3141_v12 = vadd.f32 %v4205_v44, %v5653_v23  ;;  %v3132_v39 = vpop.f32.mrb[77].mxu0 }
 0x468   : > { %3284 = vst [vmem:[%s5665_s30 + $0x48] sm:$0xff] %v3252_v28  ;;  %v3133_v6 = vadd.f32 %v5653_v23, %v3132_v39  ;;  %v4206_v9 = vpop.f32.mrb[78].mxu0  ;;  %v4600_v39 = vld [vmem:[%s4934_s11 + $0xd0] sm:$0xff] }
 0x469   : > { %v3225_v33 = vadd.f32 %v4588_v52, %v3141_v12  ;;  %v3144_v57 = vadd.f32 %v4206_v9, %v5653_v23  ;;  %v3135_v48 = vpop.f32.mrb[79].mxu0 }
 0x46a   : > { %v3223_v32 = vadd.f32 %v4589_v14, %v3133_v6  ;;  %v3136_v10 = vadd.f32 %v5653_v23, %v3135_v48 }
 0x46b   : > { %v3257_v4 = vmax.f32 %v3225_v33, 0.0  ;;  %v3226_v1 = vadd.f32 %v4590_v2, %v3144_v57  ;;  %v4601_v33 = vld [vmem:[%s4934_s11 + $0xc0] sm:$0xff]  ;;  %v4603_v2 = vld [vmem:[%s4934_s11 + $0xc8] sm:$0xff] }
 0x46c   : > { %v3255_v5 = vmax.f32 %v3223_v32, 0.0  ;;  %v3224_v49 = vadd.f32 %v4591_v19, %v3136_v10  ;;  %v4602_v32 = vld [vmem:[%s4934_s11 + $0xd8] sm:$0xff] }
 0x46d   : > { %3289 = vst [vmem:[%s5665_s30 + $0x70] sm:$0xff] %v3257_v4  ;;  %v3258_v29 = vmax.f32 %v3226_v1, 0.0 }
 0x46e   : > { %3287 = vst [vmem:[%s5665_s30 + $0x60] sm:$0xff] %v3255_v5  ;;  %v3256_v58 = vmax.f32 %v3224_v49, 0.0  ;;  %v4209_v51 = vpop.f32.mrb[80].mxu0 }
 0x46f   : > { %3290 = vst [vmem:[%s5665_s30 + $0x78] sm:$0xff] %v3258_v29  ;;  %v3157_v25 = vadd.f32 %v4209_v51, %v5653_v23  ;;  %v3148_v62 = vpop.f32.mrb[81].mxu0 }
 0x470   : > { %3288 = vst [vmem:[%s5665_s30 + $0x68] sm:$0xff] %v3256_v58  ;;  %v3149_v16 = vadd.f32 %v5653_v23, %v3148_v62  ;;  %v4210_v18 = vpop.f32.mrb[82].mxu0  ;;  %v4604_v62 = vld [vmem:[%s4934_s11 + $0xf0] sm:$0xff] }
 0x471   : > { %v3229_v0 = vadd.f32 %v4592_v24, %v3157_v25  ;;  %v3160_v26 = vadd.f32 %v4210_v18, %v5653_v23  ;;  %v3151_v7 = vpop.f32.mrb[83].mxu0 }
 0x472   : > { %v3227_v40 = vadd.f32 %v4593_v11, %v3149_v16  ;;  %v3152_v21 = vadd.f32 %v5653_v23, %v3151_v7 }
 0x473   : > { %v3261_v42 = vmax.f32 %v3229_v0, 0.0  ;;  %v3230_v15 = vadd.f32 %v4594_v46, %v3160_v26  ;;  %v4605_v0 = vld [vmem:[%s4934_s11 + $0xe0] sm:$0xff]  ;;  %v4607_v46 = vld [vmem:[%s4934_s11 + $0xe8] sm:$0xff] }
 0x474   : > { %v3259_v27 = vmax.f32 %v3227_v40, 0.0  ;;  %v3228_v37 = vadd.f32 %v4595_v38, %v3152_v21  ;;  %v4606_v40 = vld [vmem:[%s4934_s11 + $0xf8] sm:$0xff]  ;;  %s4746_s11 = smov [#allocation7]  }
 0x475   : > { %3293 = vst [vmem:[%s5665_s30 + $0x90] sm:$0xff] %v3261_v42  ;;  %v3262_v63 = vmax.f32 %v3230_v15, 0.0  ;;  %s4670_s20 = sshll.u32 %s4746_s11, 4  ;;  %s4671_s20 = int_to_ptr.vmem [resolvable:$false] %s4670_s20 }
 0x476   : > { %3291 = vst [vmem:[%s5665_s30 + $0x80] sm:$0xff] %v3259_v27  ;;  %v3260_v30 = vmax.f32 %v3228_v37, 0.0  ;;  %v4213_v59 = vpop.f32.mrb[84].mxu0  ;;  %s4672_s9 = scalar_lea.vmem %s4671_s20, 8192  ;;  %p4673_p10 = scmp.lt.s32.totalorder %s5759_s29, %s4671_s20 }
 0x477   : > { %3294 = vst [vmem:[%s5665_s30 + $0x98] sm:$0xff] %v3262_v63  ;;  %v3173_v50 = vadd.f32 %v4213_v59, %v5653_v23  ;;  %v3164_v60 = vpop.f32.mrb[85].mxu0  ;;  %p4674_p13 = scmp.lt.s32.totalorder %s4672_s9, %s4666_s22 }
 0x478   : > { %3292 = vst [vmem:[%s5665_s30 + $0x88] sm:$0xff] %v3260_v30  ;;  %v3165_v53 = vadd.f32 %v5653_v23, %v3164_v60  ;;  %v4214_v20 = vpop.f32.mrb[86].mxu0 }
 0x479   : > { %v3233_v22 = vadd.f32 %v4596_v43, %v3173_v50  ;;  %v3176_v56 = vadd.f32 %v4214_v20, %v5653_v23  ;;  %v3167_v8 = vpop.f32.mrb[87].mxu0  ;;  %p4675_p3 = por %p4674_p13, %p4673_p10 }
 0x47a   : > { %v3231_v47 = vadd.f32 %v4597_v3, %v3165_v53  ;;  %v3168_v13 = vadd.f32 %v5653_v23, %v3167_v8 }
 0x47b   : > { %v3265_v35 = vmax.f32 %v3233_v22, 0.0  ;;  %v3234_v34 = vadd.f32 %v4598_v31, %v3176_v56  ;;  %p4676_p7 = pnand %p4675_p3, %p4669_p8 }
 0x47c   : > { %v3263_v17 = vmax.f32 %v3231_v47, 0.0  ;;  %v3232_v54 = vadd.f32 %v4599_v36, %v3168_v13 }
 0x47d   : > { %3297 = vst [vmem:[%s5665_s30 + $0xb0] sm:$0xff] %v3265_v35  ;;  %v3266_v45 = vmax.f32 %v3234_v34, 0.0 }
 0x47e   : > { %3295 = vst [vmem:[%s5665_s30 + $0xa0] sm:$0xff] %v3263_v17  ;;  %v3264_v61 = vmax.f32 %v3232_v54, 0.0  ;;  %v4217_v41 = vpop.f32.mrb[88].mxu0 }
 0x47f   : > { %3298 = vst [vmem:[%s5665_s30 + $0xb8] sm:$0xff] %v3266_v45  ;;  %v3189_v55 = vadd.f32 %v4217_v41, %v5653_v23  ;;  %v3180_v28 = vpop.f32.mrb[89].mxu0 }
 0x480   : > { %3296 = vst [vmem:[%s5665_s30 + $0xa8] sm:$0xff] %v3264_v61  ;;  %v3181_v44 = vadd.f32 %v5653_v23, %v3180_v28  ;;  %v4218_v12 = vpop.f32.mrb[90].mxu0 }
 0x481   : > { %v3237_v6 = vadd.f32 %v4600_v39, %v3189_v55  ;;  %v3192_v9 = vadd.f32 %v4218_v12, %v5653_v23  ;;  %v3183_v52 = vpop.f32.mrb[91].mxu0 }
 0x482   : > { %v3235_v57 = vadd.f32 %v4601_v33, %v3181_v44  ;;  %v3184_v48 = vadd.f32 %v5653_v23, %v3183_v52 }
 0x483   : > { %v3269_v14 = vmax.f32 %v3237_v6, 0.0  ;;  %v3238_v10 = vadd.f32 %v4602_v32, %v3192_v9 }
 0x484   : > { %v3267_v4 = vmax.f32 %v3235_v57, 0.0  ;;  %v3236_v1 = vadd.f32 %v4603_v2, %v3184_v48 }
 0x485   : > { %3301 = vst [vmem:[%s5665_s30 + $0xd0] sm:$0xff] %v3269_v14  ;;  %v3270_v5 = vmax.f32 %v3238_v10, 0.0 }
 0x486   : > { %3299 = vst [vmem:[%s5665_s30 + $0xc0] sm:$0xff] %v3267_v4  ;;  %v3268_v19 = vmax.f32 %v3236_v1, 0.0  ;;  %v4221_v49 = vpop.f32.mrb[92].mxu0 }
 0x487   : > { %3302 = vst [vmem:[%s5665_s30 + $0xd8] sm:$0xff] %v3270_v5  ;;  %v3205_v29 = vadd.f32 %v4221_v49, %v5653_v23  ;;  %v3196_v58 = vpop.f32.mrb[93].mxu0 }
 0x488   : > { %3300 = vst [vmem:[%s5665_s30 + $0xc8] sm:$0xff] %v3268_v19  ;;  %v3197_v51 = vadd.f32 %v5653_v23, %v3196_v58  ;;  %v4222_v25 = vpop.f32.mrb[94].mxu0 }
 0x489   : > { %v3241_v16 = vadd.f32 %v4604_v62, %v3205_v29  ;;  %v3208_v18 = vadd.f32 %v4222_v25, %v5653_v23  ;;  %v3199_v24 = vpop.f32.mrb[95].mxu0 }
 0x48a   : > { %v3239_v26 = vadd.f32 %v4605_v0, %v3197_v51  ;;  %v3200_v7 = vadd.f32 %v5653_v23, %v3199_v24 }
 0x48b   : > { %v3273_v11 = vmax.f32 %v3241_v16, 0.0  ;;  %v3242_v21 = vadd.f32 %v4606_v40, %v3208_v18 }
 0x48c   : > { %v3271_v42 = vmax.f32 %v3239_v26, 0.0  ;;  %v3240_v15 = vadd.f32 %v4607_v46, %v3200_v7 }
 0x48d   : > { %3305 = vst [vmem:[%s5665_s30 + $0xf0] sm:$0xff] %v3273_v11  ;;  %v3274_v27 = vmax.f32 %v3242_v21, 0.0 }
 0x48e   : > { %3303 = vst [vmem:[%s5665_s30 + $0xe0] sm:$0xff] %v3271_v42  ;;  %v3272_v23 = vmax.f32 %v3240_v15, 0.0 }
 0x48f   : > { %3306 = vst [vmem:[%s5665_s30 + $0xf8] sm:$0xff] %v3274_v27 }
 0x490   : > { %3304 = vst [vmem:[%s5665_s30 + $0xe8] sm:$0xff] %v3272_v23 }
 0x491   : > { %4679 = shalt.err (!%p4676_p7)
}
 0x492   : > { %s4680_s16 = scalar_lea.hbm %s5757_s10, 4096  ;;  %s4684_s30 = scalar_lea.hbm %s5813_s7, 8192 }
 0x493   : > { %p4681_p9 = scmp.ne.s32.totalorder %s5757_s10, %s4680_s16  ;;  %p4685_p5 = scmp.lt.u32.totalorder %s5757_s10, %s5813_s7 }
 0x494   : > { %p4686_p11 = scmp.lt.u32.totalorder %s4684_s30, %s4680_s16  ;;  %p4688_p4 = scmp.lt.u32.totalorder %s4680_s16, %s5757_s10 }
 0x495   : > { %p4682_p2 = pnand %p4681_p9, %p4880_p12 }
 0x496   : > { %p4687_p1 = por %p4686_p11, %p4685_p5 }
 0x497   : > { %p4683_p0 = pneg %p4682_p2 }
 0x498   : > { %p4689_p6 = por %p4688_p4, %p4687_p1 }
 0x49a   : > { %p4690_p8 = pnand %p4689_p6, %p4683_p0 }
 0x49c   : > { %4693 = shalt.err (!%p4690_p8)
}
 0x49d   : > { %s4747_s21 = smov 128   ;;  %s4748_s22 = smov 8  }
 0x49e   : > { %4489 = dma.vmem_to_hbm [thread:$0]  (%p4880_p12), %s5759_s29, 4096, %s5757_s10, %s3308_s28, %s4747_s21, %s4747_s21, %s4748_s22  }
 0x49f PF: > { %s3336_s11 = sand.u32 1, %s4724_s24   ;;  %p5847_p10 = scmp.ne.s32.totalorder %s5825_s8, 0 }
 0x4a0   : > { %p5848_p13 = scmp.ge.s32.totalorder %s4736_s27, 2  ;;  %s3337_s20 = scalar_lea.sflag [#allocation4], %s3336_s11 }
 0x4a2   : > { %p4500_p3 = pnand %p5848_p13, %p5847_p10 }
 0x4a4   : > { %4719 = dma.done.wait (!%p4500_p3), %s3337_s20, 4096  }
 0x4a5   : > { %4721 = vsyncadd (!%p4500_p3), %s3337_s20, 4294963200  ;;  %p21_p7 = scmp.ge.s32.totalorder %s4845_s13, 4   ;;  %s5849_s24 = smov %s4728_s25 }
 0x4a6   : > { %s5850_s25 = smov %s4732_s26  ;;  %s5851_s26 = smov %s4876_s18 }
 0x4a7   : > { %s5852_s27 = smov %s4845_s13  ;;  %23 = sbr.rel (!%p21_p7) target bundleno = 6 (0x6), region = 105 }
 0x4ae   :  { %3342 = vsyncpa [#allocation3], 1 }
 0x4af   :  { %3344 = vsyncpa [#allocation3 + $0x1], 1 }
 0x4b0   :  { %3345 = vsyncpa [#allocation6], 1 }
 0x4b1   :  { %3346 = vsyncpa [#allocation4], 1 }
 0x4b2   :  { %3348 = vsyncpa [#allocation4 + $0x1], 1 }

</bundles_post_ra>
